<compile_context>
chip_gen: v6e
topology: v6e:2x2x1
jax: 0.10.0
libtpu: 0.0.40
codegen_flags: <defaults>
</compile_context>

<pallas_src>
import math

import jax
import jax.numpy as jnp
from jax.experimental import pallas as pl
from jax.experimental.pallas import tpu as pltpu

# ------------------------------ configuration ------------------------------
LATENT_DIM = 128      # in_channels  (module default 512; small TPU-friendly size)
STYLE_DIM = 128       # style_dim    (lane-dense: multiple of 128)
NUM_LAYERS = 8        # module default num_layers
MAP_LR = 0.01
BATCH = 2
TB = 128              # batch tile: full MXU row height (sweep 256 on v6e/v7x)
SQRT2 = math.sqrt(2.0)


# ------------------------------- fused kernel -------------------------------
def _make_mapping_kernel(num_layers, pixelnorm=True):
    """One kernel = PixelNorm + num_layers x (folded linear + leaky-relu)."""

    def kernel(z_ref, wt0_ref, wts_ref, b_ref, o_ref):
        x = z_ref[...]                                        # (TB, Din) f32

        if pixelnorm:
            # x / (sqrt(mean(x^2, dim=1)) + 1e-4) -- eps placement as in PyTorch
            ms = jnp.mean(x * x, axis=1, keepdims=True)
            inv = pl.reciprocal(jnp.sqrt(ms) + 1e-4, approx=True)   # EUP slot
            x = x * inv

        def layer(x, wt_bf16, b_row):
            # ELR scale / lr / previous-layer sqrt(2) are folded into wt_bf16
            # and b_row at init; MXU matmul in bf16 with f32 accumulation.
            y = jnp.dot(x.astype(jnp.bfloat16), wt_bf16,
                        preferred_element_type=jnp.float32)
            y = y + b_row                                     # (1,S) broadcast
            return jnp.where(y >= 0.0, y, 0.2 * y)            # leaky-relu(0.2)

        # first layer (d_in may differ from style_dim)
        x = layer(x, wt0_ref[...], b_ref[0:1, :])
        # remaining layers share (style_dim, style_dim) shapes -> stacked refs
        for li in range(num_layers - 1):
            x = layer(x, wts_ref[li], b_ref[li + 1:li + 2, :])

        # single residual sqrt(2) gain of the last activation
        o_ref[...] = (x * SQRT2).astype(o_ref.dtype)

    return kernel


# ------------------------------- wrapper -------------------------------------
def mapping_forward(params, z, tb=TB):
    B, din = z.shape
    num_layers = params['b'].shape[0]                         # static under jit
    S = params['b'].shape[1]

    # Ragged last block is handled by Pallas (all ops are row-independent),
    # so no wrapper-side pad / slice.
    grid = (pl.cdiv(B, tb),)

    return pl.pallas_call(
        _make_mapping_kernel(num_layers),
        out_shape=jax.ShapeDtypeStruct((B, S), jnp.float32),
        grid=grid,
        in_specs=[
            pl.BlockSpec((tb, din), lambda i: (i, 0)),                    # z tile
            pl.BlockSpec((din, S), lambda i: (0, 0)),                     # W0' (bf16)
            pl.BlockSpec((num_layers - 1, S, S), lambda i: (0, 0, 0)),    # W1..' (bf16)
            pl.BlockSpec((num_layers, S), lambda i: (0, 0)),              # all biases (f32)
        ],
        out_specs=pl.BlockSpec((tb, S), lambda i: (i, 0)),
        compiler_params=pltpu.CompilerParams(
            dimension_semantics=("parallel",)),               # megacore-friendly on v7x
    )(z, params['wt0'], params['wts'], params['b'])


# ---------------------------- parameter init ---------------------------------
def init_mapping(key, in_channels=LATENT_DIM, style_dim=STYLE_DIM,
                 num_layers=NUM_LAYERS, lr=MAP_LR):
    """Builds folded, pre-transposed bf16 weights + f32 biases (outside jit)."""
    assert num_layers >= 2
    keys = jax.random.split(key, 2 * num_layers)

    dins = [in_channels] + [style_dim] * (num_layers - 1)
    wts, bs = [], []
    for li in range(num_layers):
        # PyTorch nn.Linear stores weight as (out, in); pre-transpose to (in, out)
        w = jax.random.normal(keys[2 * li], (style_dim, dins[li]), jnp.float32)
        b = 0.01 * jax.random.normal(keys[2 * li + 1], (style_dim,), jnp.float32)
        # fold ELR scale, lr, and the previous layer's sqrt(2) activation gain
        scale = lr / math.sqrt(dins[li])
        if li > 0:
            scale *= SQRT2
        wts.append((w.T * scale).astype(jnp.bfloat16))        # (d_in, style)
        bs.append(b * lr)

    return {
        'wt0': wts[0],                                        # (in, style)    bf16
        'wts': jnp.stack(wts[1:]),                            # (L-1, S, S)    bf16
        'b': jnp.stack(bs),                                   # (L, S)         f32
    }


# ---------------------------- pure-JAX reference ------------------------------
def mapping_reference(params, z):
    """Same folded bf16 weights / f32-accum matmul math as the kernel."""
    num_layers = params['b'].shape[0]
    x = z / (jnp.sqrt(jnp.mean(z * z, axis=1, keepdims=True)) + 1e-4)

    def layer(x, wt, b_row):
        y = jnp.dot(x.astype(jnp.bfloat16), wt,
                    preferred_element_type=jnp.float32) + b_row
        return jnp.where(y >= 0.0, y, 0.2 * y)

    x = layer(x, params['wt0'], params['b'][0:1, :])
    for li in range(num_layers - 1):
        x = layer(x, params['wts'][li], params['b'][li + 1:li + 2, :])
    return x * SQRT2


# --------------------------------- main ---------------------------------------
if __name__ == "__main__":
    key = jax.random.PRNGKey(0)
    pkey, zkey = jax.random.split(key)

    params = init_mapping(pkey)
    z = jax.random.normal(zkey, (BATCH, LATENT_DIM), jnp.float32)

    fwd = jax.jit(mapping_forward)
    w = jax.block_until_ready(fwd(params, z))

    assert w.shape == (BATCH, STYLE_DIM), w.shape
    assert bool(jnp.all(jnp.isfinite(w)))

    # correctness check against a pure-JAX reference using the same folded
    # bf16 weights (self-consistent; the only deltas are the approx reciprocal
    # in pixel-norm and MXU accumulation order)
    w_ref = mapping_reference(params, z)
    max_err = float(jnp.max(jnp.abs(w - w_ref)))
    ref_scale = float(jnp.max(jnp.abs(w_ref))) + 1e-30
    assert max_err <= 5e-2 * ref_scale + 1e-30, (max_err, ref_scale)

    print("KERNEL_OK")
</pallas_src>

<mosaic_0001>
module attributes {stable_mosaic.version = 11 : i64} {
  func.func @kernel(%arg0: i32, %arg1: memref<128x128xf32, #tpu.memory_space<vmem>>, %arg2: memref<128x128xbf16, #tpu.memory_space<vmem>>, %arg3: memref<7x128x128xbf16, #tpu.memory_space<vmem>>, %arg4: memref<8x128xf32, #tpu.memory_space<vmem>>, %arg5: memref<128x128xf32, #tpu.memory_space<vmem>>) attributes {dimension_semantics = [#tpu.dimension_semantics<parallel>], iteration_bounds = array<i64: 1>, scalar_prefetch = 0 : i64, scratch_operands = 0 : i64, tpu.core_type = #tpu.core_type<tc>, window_params = [{transform_indices = @transform_0, window_bounds = array<i64: 128, 128>}, {pipeline_mode = #tpu.pipeline_mode<synchronous>, transform_indices = @transform_1, window_bounds = array<i64: 128, 128>}, {pipeline_mode = #tpu.pipeline_mode<synchronous>, transform_indices = @transform_2, window_bounds = array<i64: 7, 128, 128>}, {pipeline_mode = #tpu.pipeline_mode<synchronous>, transform_indices = @transform_3, window_bounds = array<i64: 8, 128>}, {transform_indices = @transform_4, window_bounds = array<i64: 128, 128>}]} {
    %c0 = arith.constant 0 : index
    %c0_0 = arith.constant 0 : index
    %0 = vector.load %arg1[%c0, %c0_0] : memref<128x128xf32, #tpu.memory_space<vmem>>, vector<128x128xf32>
    %1 = arith.mulf %0, %0 : vector<128x128xf32>
    %cst = arith.constant dense<0.000000e+00> : vector<128xf32>
    %2 = vector.multi_reduction <add>, %1, %cst [1] : vector<128x128xf32> to vector<128xf32>
    %3 = vector.shape_cast %2 : vector<128xf32> to vector<128x1xf32>
    %cst_1 = arith.constant 1.280000e+02 : f32
    %4 = vector.broadcast %cst_1 : f32 to vector<128x1xf32>
    %5 = arith.divf %3, %4 : vector<128x1xf32>
    %6 = math.sqrt %5 : vector<128x1xf32>
    %cst_2 = arith.constant 9.99999974E-5 : f32
    %7 = vector.broadcast %cst_2 : f32 to vector<128x1xf32>
    %8 = arith.addf %6, %7 : vector<128x1xf32>
    %9 = tpu.reciprocal %8 {approx = true} : vector<128x1xf32> -> vector<128x1xf32>
    %10 = vector.broadcast %9 : vector<128x1xf32> to vector<128x128xf32>
    %11 = arith.mulf %0, %10 : vector<128x128xf32>
    %c0_3 = arith.constant 0 : index
    %c0_4 = arith.constant 0 : index
    %12 = vector.load %arg2[%c0_3, %c0_4] : memref<128x128xbf16, #tpu.memory_space<vmem>>, vector<128x128xbf16>
    %c0_5 = arith.constant 0 : index
    %c0_6 = arith.constant 0 : index
    %13 = vector.load %arg4[%c0_5, %c0_6] : memref<8x128xf32, #tpu.memory_space<vmem>>, vector<1x128xf32>
    %14 = arith.truncf %11 : vector<128x128xf32> to vector<128x128xbf16>
    %cst_7 = arith.constant dense<0.000000e+00> : vector<128x128xf32>
    %15 = tpu.matmul %14, %12, %cst_7 {dimension_numbers = #tpu.dot_dimension_numbers<[1], [0], [0], [1], [0, 0, 1, 1], [], []>} : vector<128x128xbf16>, vector<128x128xbf16>, vector<128x128xf32> -> vector<128x128xf32>
    %16 = vector.broadcast %13 : vector<1x128xf32> to vector<128x128xf32>
    %17 = arith.addf %15, %16 : vector<128x128xf32>
    %cst_8 = arith.constant 0.000000e+00 : f32
    %18 = vector.broadcast %cst_8 : f32 to vector<128x128xf32>
    %19 = arith.cmpf oge, %17, %18 : vector<128x128xf32>
    %cst_9 = arith.constant 2.000000e-01 : f32
    %20 = vector.broadcast %cst_9 : f32 to vector<128x128xf32>
    %21 = arith.mulf %20, %17 : vector<128x128xf32>
    %22 = arith.select %19, %17, %21 : vector<128x128xi1>, vector<128x128xf32>
    %c0_10 = arith.constant 0 : index
    %c0_11 = arith.constant 0 : index
    %c0_12 = arith.constant 0 : index
    %23 = vector.load %arg3[%c0_10, %c0_11, %c0_12] : memref<7x128x128xbf16, #tpu.memory_space<vmem>>, vector<1x128x128xbf16>
    %24 = vector.shape_cast %23 : vector<1x128x128xbf16> to vector<128x128xbf16>
    %c1 = arith.constant 1 : index
    %c0_13 = arith.constant 0 : index
    %25 = vector.load %arg4[%c1, %c0_13] : memref<8x128xf32, #tpu.memory_space<vmem>>, vector<1x128xf32>
    %26 = arith.truncf %22 : vector<128x128xf32> to vector<128x128xbf16>
    %cst_14 = arith.constant dense<0.000000e+00> : vector<128x128xf32>
    %27 = tpu.matmul %26, %24, %cst_14 {dimension_numbers = #tpu.dot_dimension_numbers<[1], [0], [0], [1], [0, 0, 1, 1], [], []>} : vector<128x128xbf16>, vector<128x128xbf16>, vector<128x128xf32> -> vector<128x128xf32>
    %28 = vector.broadcast %25 : vector<1x128xf32> to vector<128x128xf32>
    %29 = arith.addf %27, %28 : vector<128x128xf32>
    %cst_15 = arith.constant 0.000000e+00 : f32
    %30 = vector.broadcast %cst_15 : f32 to vector<128x128xf32>
    %31 = arith.cmpf oge, %29, %30 : vector<128x128xf32>
    %cst_16 = arith.constant 2.000000e-01 : f32
    %32 = vector.broadcast %cst_16 : f32 to vector<128x128xf32>
    %33 = arith.mulf %32, %29 : vector<128x128xf32>
    %34 = arith.select %31, %29, %33 : vector<128x128xi1>, vector<128x128xf32>
    %c1_17 = arith.constant 1 : index
    %c0_18 = arith.constant 0 : index
    %c0_19 = arith.constant 0 : index
    %35 = vector.load %arg3[%c1_17, %c0_18, %c0_19] : memref<7x128x128xbf16, #tpu.memory_space<vmem>>, vector<1x128x128xbf16>
    %36 = vector.shape_cast %35 : vector<1x128x128xbf16> to vector<128x128xbf16>
    %c2 = arith.constant 2 : index
    %c0_20 = arith.constant 0 : index
    %37 = vector.load %arg4[%c2, %c0_20] : memref<8x128xf32, #tpu.memory_space<vmem>>, vector<1x128xf32>
    %38 = arith.truncf %34 : vector<128x128xf32> to vector<128x128xbf16>
    %cst_21 = arith.constant dense<0.000000e+00> : vector<128x128xf32>
    %39 = tpu.matmul %38, %36, %cst_21 {dimension_numbers = #tpu.dot_dimension_numbers<[1], [0], [0], [1], [0, 0, 1, 1], [], []>} : vector<128x128xbf16>, vector<128x128xbf16>, vector<128x128xf32> -> vector<128x128xf32>
    %40 = vector.broadcast %37 : vector<1x128xf32> to vector<128x128xf32>
    %41 = arith.addf %39, %40 : vector<128x128xf32>
    %cst_22 = arith.constant 0.000000e+00 : f32
    %42 = vector.broadcast %cst_22 : f32 to vector<128x128xf32>
    %43 = arith.cmpf oge, %41, %42 : vector<128x128xf32>
    %cst_23 = arith.constant 2.000000e-01 : f32
    %44 = vector.broadcast %cst_23 : f32 to vector<128x128xf32>
    %45 = arith.mulf %44, %41 : vector<128x128xf32>
    %46 = arith.select %43, %41, %45 : vector<128x128xi1>, vector<128x128xf32>
    %c2_24 = arith.constant 2 : index
    %c0_25 = arith.constant 0 : index
    %c0_26 = arith.constant 0 : index
    %47 = vector.load %arg3[%c2_24, %c0_25, %c0_26] : memref<7x128x128xbf16, #tpu.memory_space<vmem>>, vector<1x128x128xbf16>
    %48 = vector.shape_cast %47 : vector<1x128x128xbf16> to vector<128x128xbf16>
    %c3 = arith.constant 3 : index
    %c0_27 = arith.constant 0 : index
    %49 = vector.load %arg4[%c3, %c0_27] : memref<8x128xf32, #tpu.memory_space<vmem>>, vector<1x128xf32>
    %50 = arith.truncf %46 : vector<128x128xf32> to vector<128x128xbf16>
    %cst_28 = arith.constant dense<0.000000e+00> : vector<128x128xf32>
    %51 = tpu.matmul %50, %48, %cst_28 {dimension_numbers = #tpu.dot_dimension_numbers<[1], [0], [0], [1], [0, 0, 1, 1], [], []>} : vector<128x128xbf16>, vector<128x128xbf16>, vector<128x128xf32> -> vector<128x128xf32>
    %52 = vector.broadcast %49 : vector<1x128xf32> to vector<128x128xf32>
    %53 = arith.addf %51, %52 : vector<128x128xf32>
    %cst_29 = arith.constant 0.000000e+00 : f32
    %54 = vector.broadcast %cst_29 : f32 to vector<128x128xf32>
    %55 = arith.cmpf oge, %53, %54 : vector<128x128xf32>
    %cst_30 = arith.constant 2.000000e-01 : f32
    %56 = vector.broadcast %cst_30 : f32 to vector<128x128xf32>
    %57 = arith.mulf %56, %53 : vector<128x128xf32>
    %58 = arith.select %55, %53, %57 : vector<128x128xi1>, vector<128x128xf32>
    %c3_31 = arith.constant 3 : index
    %c0_32 = arith.constant 0 : index
    %c0_33 = arith.constant 0 : index
    %59 = vector.load %arg3[%c3_31, %c0_32, %c0_33] : memref<7x128x128xbf16, #tpu.memory_space<vmem>>, vector<1x128x128xbf16>
    %60 = vector.shape_cast %59 : vector<1x128x128xbf16> to vector<128x128xbf16>
    %c4 = arith.constant 4 : index
    %c0_34 = arith.constant 0 : index
    %61 = vector.load %arg4[%c4, %c0_34] : memref<8x128xf32, #tpu.memory_space<vmem>>, vector<1x128xf32>
    %62 = arith.truncf %58 : vector<128x128xf32> to vector<128x128xbf16>
    %cst_35 = arith.constant dense<0.000000e+00> : vector<128x128xf32>
    %63 = tpu.matmul %62, %60, %cst_35 {dimension_numbers = #tpu.dot_dimension_numbers<[1], [0], [0], [1], [0, 0, 1, 1], [], []>} : vector<128x128xbf16>, vector<128x128xbf16>, vector<128x128xf32> -> vector<128x128xf32>
    %64 = vector.broadcast %61 : vector<1x128xf32> to vector<128x128xf32>
    %65 = arith.addf %63, %64 : vector<128x128xf32>
    %cst_36 = arith.constant 0.000000e+00 : f32
    %66 = vector.broadcast %cst_36 : f32 to vector<128x128xf32>
    %67 = arith.cmpf oge, %65, %66 : vector<128x128xf32>
    %cst_37 = arith.constant 2.000000e-01 : f32
    %68 = vector.broadcast %cst_37 : f32 to vector<128x128xf32>
    %69 = arith.mulf %68, %65 : vector<128x128xf32>
    %70 = arith.select %67, %65, %69 : vector<128x128xi1>, vector<128x128xf32>
    %c4_38 = arith.constant 4 : index
    %c0_39 = arith.constant 0 : index
    %c0_40 = arith.constant 0 : index
    %71 = vector.load %arg3[%c4_38, %c0_39, %c0_40] : memref<7x128x128xbf16, #tpu.memory_space<vmem>>, vector<1x128x128xbf16>
    %72 = vector.shape_cast %71 : vector<1x128x128xbf16> to vector<128x128xbf16>
    %c5 = arith.constant 5 : index
    %c0_41 = arith.constant 0 : index
    %73 = vector.load %arg4[%c5, %c0_41] : memref<8x128xf32, #tpu.memory_space<vmem>>, vector<1x128xf32>
    %74 = arith.truncf %70 : vector<128x128xf32> to vector<128x128xbf16>
    %cst_42 = arith.constant dense<0.000000e+00> : vector<128x128xf32>
    %75 = tpu.matmul %74, %72, %cst_42 {dimension_numbers = #tpu.dot_dimension_numbers<[1], [0], [0], [1], [0, 0, 1, 1], [], []>} : vector<128x128xbf16>, vector<128x128xbf16>, vector<128x128xf32> -> vector<128x128xf32>
    %76 = vector.broadcast %73 : vector<1x128xf32> to vector<128x128xf32>
    %77 = arith.addf %75, %76 : vector<128x128xf32>
    %cst_43 = arith.constant 0.000000e+00 : f32
    %78 = vector.broadcast %cst_43 : f32 to vector<128x128xf32>
    %79 = arith.cmpf oge, %77, %78 : vector<128x128xf32>
    %cst_44 = arith.constant 2.000000e-01 : f32
    %80 = vector.broadcast %cst_44 : f32 to vector<128x128xf32>
    %81 = arith.mulf %80, %77 : vector<128x128xf32>
    %82 = arith.select %79, %77, %81 : vector<128x128xi1>, vector<128x128xf32>
    %c5_45 = arith.constant 5 : index
    %c0_46 = arith.constant 0 : index
    %c0_47 = arith.constant 0 : index
    %83 = vector.load %arg3[%c5_45, %c0_46, %c0_47] : memref<7x128x128xbf16, #tpu.memory_space<vmem>>, vector<1x128x128xbf16>
    %84 = vector.shape_cast %83 : vector<1x128x128xbf16> to vector<128x128xbf16>
    %c6 = arith.constant 6 : index
    %c0_48 = arith.constant 0 : index
    %85 = vector.load %arg4[%c6, %c0_48] : memref<8x128xf32, #tpu.memory_space<vmem>>, vector<1x128xf32>
    %86 = arith.truncf %82 : vector<128x128xf32> to vector<128x128xbf16>
    %cst_49 = arith.constant dense<0.000000e+00> : vector<128x128xf32>
    %87 = tpu.matmul %86, %84, %cst_49 {dimension_numbers = #tpu.dot_dimension_numbers<[1], [0], [0], [1], [0, 0, 1, 1], [], []>} : vector<128x128xbf16>, vector<128x128xbf16>, vector<128x128xf32> -> vector<128x128xf32>
    %88 = vector.broadcast %85 : vector<1x128xf32> to vector<128x128xf32>
    %89 = arith.addf %87, %88 : vector<128x128xf32>
    %cst_50 = arith.constant 0.000000e+00 : f32
    %90 = vector.broadcast %cst_50 : f32 to vector<128x128xf32>
    %91 = arith.cmpf oge, %89, %90 : vector<128x128xf32>
    %cst_51 = arith.constant 2.000000e-01 : f32
    %92 = vector.broadcast %cst_51 : f32 to vector<128x128xf32>
    %93 = arith.mulf %92, %89 : vector<128x128xf32>
    %94 = arith.select %91, %89, %93 : vector<128x128xi1>, vector<128x128xf32>
    %c6_52 = arith.constant 6 : index
    %c0_53 = arith.constant 0 : index
    %c0_54 = arith.constant 0 : index
    %95 = vector.load %arg3[%c6_52, %c0_53, %c0_54] : memref<7x128x128xbf16, #tpu.memory_space<vmem>>, vector<1x128x128xbf16>
    %96 = vector.shape_cast %95 : vector<1x128x128xbf16> to vector<128x128xbf16>
    %c7 = arith.constant 7 : index
    %c0_55 = arith.constant 0 : index
    %97 = vector.load %arg4[%c7, %c0_55] : memref<8x128xf32, #tpu.memory_space<vmem>>, vector<1x128xf32>
    %98 = arith.truncf %94 : vector<128x128xf32> to vector<128x128xbf16>
    %cst_56 = arith.constant dense<0.000000e+00> : vector<128x128xf32>
    %99 = tpu.matmul %98, %96, %cst_56 {dimension_numbers = #tpu.dot_dimension_numbers<[1], [0], [0], [1], [0, 0, 1, 1], [], []>} : vector<128x128xbf16>, vector<128x128xbf16>, vector<128x128xf32> -> vector<128x128xf32>
    %100 = vector.broadcast %97 : vector<1x128xf32> to vector<128x128xf32>
    %101 = arith.addf %99, %100 : vector<128x128xf32>
    %cst_57 = arith.constant 0.000000e+00 : f32
    %102 = vector.broadcast %cst_57 : f32 to vector<128x128xf32>
    %103 = arith.cmpf oge, %101, %102 : vector<128x128xf32>
    %cst_58 = arith.constant 2.000000e-01 : f32
    %104 = vector.broadcast %cst_58 : f32 to vector<128x128xf32>
    %105 = arith.mulf %104, %101 : vector<128x128xf32>
    %106 = arith.select %103, %101, %105 : vector<128x128xi1>, vector<128x128xf32>
    %cst_59 = arith.constant 1.41421354 : f32
    %107 = vector.broadcast %cst_59 : f32 to vector<128x128xf32>
    %108 = arith.mulf %106, %107 : vector<128x128xf32>
    %c0_60 = arith.constant 0 : index
    %c0_61 = arith.constant 0 : index
    %109 = vector.load %arg5[%c0_60, %c0_61] : memref<128x128xf32, #tpu.memory_space<vmem>>, vector<128x128xf32>
    tpu.vector_store %arg5[%c0_60, %c0_61], %108 {strides = array<i32>} : memref<128x128xf32, #tpu.memory_space<vmem>>, vector<128x128xf32>,
    return
  }
  func.func @transform_0(%arg0: i32) -> (i32, i32) {
    %c0_i32 = arith.constant 0 : i32
    %c0_i32_0 = arith.constant 0 : i32
    return %arg0, %c0_i32 : i32, i32
  }
  func.func @transform_1(%arg0: i32) -> (i32, i32) {
    %c0_i32 = arith.constant 0 : i32
    %c0_i32_0 = arith.constant 0 : i32
    %c0_i32_1 = arith.constant 0 : i32
    return %c0_i32, %c0_i32_0 : i32, i32
  }
  func.func @transform_2(%arg0: i32) -> (i32, i32, i32) {
    %c0_i32 = arith.constant 0 : i32
    %c0_i32_0 = arith.constant 0 : i32
    %c0_i32_1 = arith.constant 0 : i32
    %c0_i32_2 = arith.constant 0 : i32
    return %c0_i32, %c0_i32_0, %c0_i32_1 : i32, i32, i32
  }
  func.func @transform_3(%arg0: i32) -> (i32, i32) {
    %c0_i32 = arith.constant 0 : i32
    %c0_i32_0 = arith.constant 0 : i32
    %c0_i32_1 = arith.constant 0 : i32
    return %c0_i32, %c0_i32_0 : i32, i32
  }
  func.func @transform_4(%arg0: i32) -> (i32, i32) {
    %c0_i32 = arith.constant 0 : i32
    %c0_i32_0 = arith.constant 0 : i32
    return %arg0, %c0_i32 : i32, i32
  }
}

</mosaic_0001>

<bundles_post_ra>
// kernel: mapping_forward.1
= control target key start
LH: loop header
LB: loop body
LE: loop exit
PB: predicated region body
PF: predicated region fallthrough
CT: control target
= control target key end

     0   :  { %9 = vsyncpa [#allocation3], 0  ;;  %s3317_s0 = inlined_call_operand.vmem [shape: f32[2,128], index: 0, kind: input, shape index: {}]   ;;  %s3318_s1 = inlined_call_operand.hbm [shape: bf16[128,128], index: 1, kind: input, shape index: {}]   ;;  %s3319_s2 = inlined_call_operand.hbm [shape: bf16[7,128,128], index: 2, kind: input, shape index: {}]   ;;  %s3320_s3 = inlined_call_operand.hbm [shape: f32[8,128], index: 3, kind: input, shape index: {}]   ;;  %s3321_s4 = inlined_call_operand.hbm [shape: f32[2,128], index: 4, kind: output, shape index: {}]  }
   0x1   :  { %10 = vsyncpa [#allocation6], 0 }
   0x2   :  { %11 = vsyncpa [#allocation4], 0  ;;  %s2809_s15 = smov [#allocation5]   ;;  %s2810_s17 = smov [#allocation2]  }
   0x3   :  { %s31_s16 = sshll.u32 %s2809_s15, 4  ;;  %s19_s18 = sshll.u32 %s2810_s17, 4  ;;  %s32_s16 = int_to_ptr.vmem [resolvable:$true] %s31_s16  ;;  %s20_s18 = int_to_ptr.vmem [resolvable:$true] %s19_s18 }
   0x4   :  { %s2731_s19 = scalar_lea.vmem %s32_s16, 7168  ;;  %p2736_p1 = scmp.lt.s32.totalorder %s32_s16, %s32_s16 }
   0x5   :  { %p2732_p0 = scmp.ne.s32.totalorder %s32_s16, %s2731_s19  ;;  %p2737_p2 = scmp.lt.s32.totalorder %s2731_s19, %s2731_s19 }
   0x7   :  { %p2738_p3 = por %p2737_p2, %p2736_p1 }
   0x9   :  { %p2739_p4 = pnand %p2738_p3, %p2732_p0 }
   0xb   :  { %2742 = shalt.err (!%p2739_p4)
}
   0xc   :  { %s2811_s20 = smov 64   ;;  %s2812_s21 = smov 4  }
   0xd   :  { %37 = dma.hbm_to_vmem [thread:$0]  %s3319_s2, 7168, %s32_s16, [#allocation6], %s2811_s20, %s2811_s20, %s2812_s21  }
   0xe   :  { %s2751_s24 = scalar_lea.vmem %s20_s18, 1024  ;;  %p2756_p6 = scmp.lt.s32.totalorder %s20_s18, %s20_s18 }
   0xf   :  { %p2752_p5 = scmp.ne.s32.totalorder %s20_s18, %s2751_s24  ;;  %p2757_p7 = scmp.lt.s32.totalorder %s2751_s24, %s2751_s24 }
  0x11   :  { %p2758_p8 = por %p2757_p7, %p2756_p6 }
  0x13   :  { %p2759_p9 = pnand %p2758_p8, %p2752_p5 }
  0x15   :  { %2762 = shalt.err (!%p2759_p9)
}
  0x16   :  { %25 = dma.hbm_to_vmem [thread:$0]  %s3318_s1, 1024, %s20_s18, [#allocation3], %s2811_s20, %s2811_s20, %s2812_s21  }
  0x17   :  { %s2813_s27 = smov [#allocation7]  }
  0x18   :  { %s44_s28 = sshll.u32 %s2813_s27, 4  ;;  %s45_s28 = int_to_ptr.vmem [resolvable:$true] %s44_s28 }
  0x19   :  { %s2771_s29 = scalar_lea.vmem %s45_s28, 128  ;;  %p2776_p11 = scmp.lt.s32.totalorder %s45_s28, %s45_s28 }
  0x1a   :  { %p2772_p10 = scmp.ne.s32.totalorder %s45_s28, %s2771_s29  ;;  %p2777_p12 = scmp.lt.s32.totalorder %s2771_s29, %s2771_s29 }
  0x1c   :  { %p2778_p13 = por %p2777_p12, %p2776_p11 }
  0x1e   :  { %p2779_p0 = pnand %p2778_p13, %p2772_p10 }
  0x20   :  { %2782 = shalt.err (!%p2779_p0)
}
  0x21   :  { %47 = dma.hbm_to_vmem [thread:$0]  %s3320_s3, 128, %s45_s28, [#allocation6]  }
  0x22   :  { %2803 = dma.done.wait [#allocation3], 1024  }
  0x23   :  { %2804 = vsyncadd [#allocation3], 4294966272 }
  0x24   :  { %2805 = dma.done.wait [#allocation6], 7296  }
  0x25   :  { %2806 = vsyncadd [#allocation6], 4294960000  ;;  %v2854_v0 = vld [vmem:[%s3317_s0 + $0x10] sm:$0xff]  ;;  %v2859_v1 = vld [vmem:[%s3317_s0] sm:$0xff] }
  0x26   :  { %v2864_v2 = vld [vmem:[%s3317_s0 + $0x18] sm:$0xff]  ;;  %v76_v3 = vmul.f32 %v2854_v0, %v2854_v0  ;;  %v74_v4 = vmul.f32 %v2859_v1, %v2859_v1  ;;  %v2873_v5 = vld [vmem:[%s3317_s0 + $0x8] sm:$0xff]  ;;  %v2887_v9 = vld [vmem:[%s3317_s0 + $0x20] sm:$0xff] }
  0x27   :  { %v77_v6 = vmul.f32 %v2864_v2, %v2864_v2  ;;  %v75_v7 = vmul.f32 %v2873_v5, %v2873_v5  ;;  %v2882_v8 = vld [vmem:[%s3317_s0 + $0x28] sm:$0xff]  ;;  %v2892_v10 = vld [vmem:[%s3317_s0 + $0x38] sm:$0xff]  ;;  %v2897_v11 = vld [vmem:[%s3317_s0 + $0x30] sm:$0xff]  ;;  %v78_v13 = vmul.f32 %v2887_v9, %v2887_v9 }
  0x28   :  { %94 = vadd.xlane.f32.xlu1 %v76_v3  ;;  %90 = vadd.xlane.f32.xlu0 %v74_v4  ;;  %v79_v12 = vmul.f32 %v2882_v8, %v2882_v8  ;;  %v2906_v14 = vld [vmem:[%s3317_s0 + $0x48] sm:$0xff]  ;;  %v2911_v15 = vld [vmem:[%s3317_s0 + $0x40] sm:$0xff]  ;;  %v81_v16 = vmul.f32 %v2892_v10, %v2892_v10  ;;  %v80_v17 = vmul.f32 %v2897_v11, %v2897_v11  ;;  %v2920_v18 = vld [vmem:[%s3317_s0 + $0x58] sm:$0xff] }
  0x29   :  { %v2925_v19 = vld [vmem:[%s3317_s0 + $0x50] sm:$0xff]  ;;  %v83_v20 = vmul.f32 %v2906_v14, %v2906_v14  ;;  %v82_v21 = vmul.f32 %v2911_v15, %v2911_v15  ;;  %v2934_v22 = vld [vmem:[%s3317_s0 + $0x68] sm:$0xff]  ;;  %v2939_v23 = vld [vmem:[%s3317_s0 + $0x60] sm:$0xff]  ;;  %v85_v24 = vmul.f32 %v2920_v18, %v2920_v18 }
  0x2a   :  { %v84_v25 = vmul.f32 %v2925_v19, %v2925_v19  ;;  %v2948_v26 = vld [vmem:[%s3317_s0 + $0x78] sm:$0xff]  ;;  %v2953_v27 = vld [vmem:[%s3317_s0 + $0x70] sm:$0xff]  ;;  %v87_v28 = vmul.f32 %v2934_v22, %v2934_v22  ;;  %v86_v29 = vmul.f32 %v2939_v23, %v2939_v23  ;;  %v2597_v34 = vld [vmem:[#allocation2 + $0x28] sm:$0xff]  }
  0x2b   :  { %v2595_v30 = vld [vmem:[#allocation2 + $0x38] sm:$0xff]   ;;  %v89_v31 = vmul.f32 %v2948_v26, %v2948_v26  ;;  %v88_v32 = vmul.f32 %v2953_v27, %v2953_v27  ;;  %v2596_v33 = vld [vmem:[#allocation2 + $0x30] sm:$0xff]   ;;  %v2598_v35 = vld [vmem:[#allocation2 + $0x20] sm:$0xff]  }
  0x2c   :  { %96 = vadd.xlane.f32.xlu1 %v77_v6  ;;  %92 = vadd.xlane.f32.xlu0 %v75_v7  ;;  %v2599_v36 = vld [vmem:[#allocation2 + $0x18] sm:$0xff]   ;;  %v2600_v37 = vld [vmem:[#allocation2 + $0x10] sm:$0xff]   ;;  %v2601_v38 = vld [vmem:[#allocation2 + $0x8] sm:$0xff]  }
  0x2d   :  { %2331 = vmatprep.subr.bf16.mxu0 %v2595_v30  ;;  %v2602_v39 = vld [vmem:[#allocation2] sm:$0xff]   ;;  %v2603_v40 = vld [vmem:[#allocation5 + $0x38] sm:$0xff]   ;;  %v2604_v41 = vld [vmem:[#allocation5 + $0x30] sm:$0xff]  }
  0x2e   :  { %2332 = vmatpush3.bf16.msra.mxu0 %v2595_v30  ;;  %2363 = vmatprep.subr.bf16.mxu1 %v2603_v40  ;;  %v2605_v42 = vld [vmem:[#allocation5 + $0x28] sm:$0xff]   ;;  %v2606_v43 = vld [vmem:[#allocation5 + $0x20] sm:$0xff]   ;;  %v2607_v44 = vld [vmem:[#allocation5 + $0x18] sm:$0xff]  }
  0x2f   :  { %2333 = vmatprep.subr.bf16.mxu0 %v2596_v33  ;;  %2364 = vmatpush3.bf16.msra.mxu1 %v2603_v40 }
  0x30   :  { %100 = vadd.xlane.f32.xlu1 %v79_v12  ;;  %98 = vadd.xlane.f32.xlu0 %v78_v13 }
  0x31   :  { %2365 = vmatprep.subr.bf16.mxu1 %v2604_v41 }
  0x32   :  { %2334 = vmatpush3.bf16.msra.mxu0 %v2596_v33 }
  0x33   :  { %2335 = vmatprep.subr.bf16.mxu0 %v2597_v34  ;;  %2366 = vmatpush3.bf16.msra.mxu1 %v2604_v41 }
  0x34   :  { %104 = vadd.xlane.f32.xlu1 %v81_v16  ;;  %102 = vadd.xlane.f32.xlu0 %v80_v17 }
  0x35   :  { %2367 = vmatprep.subr.bf16.mxu1 %v2605_v42 }
  0x36   :  { %2336 = vmatpush3.bf16.msra.mxu0 %v2597_v34 }
  0x37   :  { %2337 = vmatprep.subr.bf16.mxu0 %v2598_v35  ;;  %2368 = vmatpush3.bf16.msra.mxu1 %v2605_v42 }
  0x38   :  { %108 = vadd.xlane.f32.xlu1 %v83_v20  ;;  %106 = vadd.xlane.f32.xlu0 %v82_v21 }
  0x39   :  { %2369 = vmatprep.subr.bf16.mxu1 %v2606_v43 }
  0x3a   :  { %2338 = vmatpush3.bf16.msra.mxu0 %v2598_v35 }
  0x3b   :  { %2339 = vmatprep.subr.bf16.mxu0 %v2599_v36  ;;  %2370 = vmatpush3.bf16.msra.mxu1 %v2606_v43 }
  0x3c   :  { %112 = vadd.xlane.f32.xlu1 %v85_v24  ;;  %110 = vadd.xlane.f32.xlu0 %v84_v25 }
  0x3d   :  { %2371 = vmatprep.subr.bf16.mxu1 %v2607_v44 }
  0x3e   :  { %2340 = vmatpush3.bf16.msra.mxu0 %v2599_v36 }
  0x3f   :  { %2341 = vmatprep.subr.bf16.mxu0 %v2600_v37  ;;  %2372 = vmatpush3.bf16.msra.mxu1 %v2607_v44 }
  0x40   :  { %116 = vadd.xlane.f32.xlu1 %v87_v28  ;;  %114 = vadd.xlane.f32.xlu0 %v86_v29 }
  0x42   :  { %2342 = vmatpush3.bf16.msra.mxu0 %v2600_v37 }
  0x43   :  { %2343 = vmatprep.subr.bf16.mxu0 %v2601_v38 }
  0x44   :  { %120 = vadd.xlane.f32.xlu1 %v89_v31  ;;  %118 = vadd.xlane.f32.xlu0 %v88_v32 }
  0x46   :  { %2344 = vmatpush3.bf16.msra.mxu0 %v2601_v38 }
  0x47   :  { %2345 = vmatprep.subr.bf16.mxu0 %v2602_v39 }
  0x4a   :  { %2346 = vmatpush3.bf16.msra.mxu0 %v2602_v39 }
  0xb1   :  { %v95_v45 = vpop.xlane.xlu1 %94  ;;  %v91_v46 = vpop.xlane.xlu0 %90 }
  0xb2   :  { %v123_v47 = vmul.f32 0.0078125, %v91_v46  ;;  %v2963_v48 = vmul.f32 0.0078125, %v95_v45 }
  0xb4   :  { %2659 = vrsqrt.f32 %v123_v47  ;;  %vm155_vm0 = vcmp.eq.f32.partialorder %v2963_v48, inf  ;;  %v158_v6 = vand.u32 2147483648, %v2963_v48  ;;  %vm141_vm1 = vcmp.eq.f32.partialorder %v123_v47, inf }
  0xb5   :  { %v97_v49 = vpop.xlane.xlu1 %96  ;;  %v93_v50 = vpop.xlane.xlu0 %92  ;;  %2661 = vrsqrt.f32 %v2963_v48  ;;  %vm143_vm2 = vcmp.eq.f32.partialorder %v123_v47, 0.0  ;;  %v144_v13 = vand.u32 2147483648, %v123_v47  ;;  %vm157_vm3 = vcmp.eq.f32.partialorder %v2963_v48, 0.0 }
  0xb6   :  { %v2965_v51 = vmul.f32 0.0078125, %v97_v49  ;;  %v2967_v52 = vmul.f32 0.0078125, %v93_v50 }
  0xb8   :  { %2663 = vrsqrt.f32 %v2967_v52  ;;  %vm162_vm4 = vcmp.eq.f32.partialorder %v2965_v51, inf  ;;  %v165_v17 = vand.u32 2147483648, %v2965_v51  ;;  %vm148_vm5 = vcmp.eq.f32.partialorder %v2967_v52, inf }
  0xb9   :  { %v101_v53 = vpop.xlane.xlu1 %100  ;;  %v99_v54 = vpop.xlane.xlu0 %98  ;;  %2665 = vrsqrt.f32 %v2965_v51  ;;  %vm150_vm6 = vcmp.eq.f32.partialorder %v2967_v52, 0.0  ;;  %v151_v25 = vand.u32 2147483648, %v2967_v52  ;;  %vm164_vm10 = vcmp.eq.f32.partialorder %v2965_v51, 0.0 }
  0xba   :  { %v2972_v55 = vmul.f32 0.0078125, %v101_v53  ;;  %v2974_v56 = vmul.f32 0.0078125, %v99_v54 }
  0xbc   :  { %2667 = vrsqrt.f32 %v2972_v55  ;;  %v179_v32 = vand.u32 2147483648, %v2972_v55  ;;  %vm176_vm7 = vcmp.eq.f32.partialorder %v2972_v55, inf  ;;  %vm169_vm8 = vcmp.eq.f32.partialorder %v2974_v56, inf }
  0xbd   :  { %2669 = vrsqrt.f32 %v2974_v56  ;;  %v105_v57 = vpop.xlane.xlu1 %104  ;;  %v103_v58 = vpop.xlane.xlu0 %102  ;;  %v172_v34 = vand.u32 2147483648, %v2974_v56  ;;  %vm171_vm11 = vcmp.eq.f32.partialorder %v2974_v56, 0.0  ;;  %vm178_vm13 = vcmp.eq.f32.partialorder %v2972_v55, 0.0 }
  0xbe   :  { %v2978_v59 = vmul.f32 0.0078125, %v105_v57  ;;  %v2980_v60 = vmul.f32 0.0078125, %v103_v58 }
  0xc0   :  { %2671 = vrsqrt.f32 %v2978_v59  ;;  %vm190_vm9 = vcmp.eq.f32.partialorder %v2978_v59, inf  ;;  %v193_v38 = vand.u32 2147483648, %v2978_v59  ;;  %vm183_vm12 = vcmp.eq.f32.partialorder %v2980_v60, inf }
  0xc1   :  { %2673 = vrsqrt.f32 %v2980_v60  ;;  %v109_v61 = vpop.xlane.xlu1 %108  ;;  %v107_v62 = vpop.xlane.xlu0 %106  ;;  %v186_v43 = vand.u32 2147483648, %v2980_v60  ;;  %vm185_vm15 = vcmp.eq.f32.partialorder %v2980_v60, 0.0 }
  0xc2   :  { %v2660_v63 = vpop.eup %2659  ;;  %v2984_v3 = vmul.f32 0.0078125, %v109_v61  ;;  %v2986_v4 = vmul.f32 0.0078125, %v107_v62 }
  0xc3   :  { %v140_v7 = vmul.f32 %v2660_v63, %v123_v47  ;;  %v2662_v12 = vpop.eup %2661 }
  0xc4   :  { %2675 = vrsqrt.f32 %v2984_v3  ;;  %v154_v30 = vmul.f32 %v2662_v12, %v2963_v48  ;;  %vm204_vm14 = vcmp.eq.f32.partialorder %v2984_v3, inf  ;;  %v207_v50 = vand.u32 2147483648, %v2984_v3 }
  0xc5   :  { %v142_v16 = vsel %vm141_vm1, %v123_v47, %v140_v7  ;;  %2677 = vrsqrt.f32 %v2986_v4  ;;  %v113_v20 = vpop.xlane.xlu1 %112  ;;  %v111_v21 = vpop.xlane.xlu0 %110  ;;  %vm197_vm1 = vcmp.eq.f32.partialorder %v2986_v4, inf  ;;  %v200_v58 = vand.u32 2147483648, %v2986_v4 }
  0xc6   :  { %v2664_v24 = vpop.eup %2663  ;;  %v2998_v28 = vmul.f32 0.0078125, %v113_v20  ;;  %v3003_v33 = vmul.f32 0.0078125, %v111_v21  ;;  %v145_v35 = vsel %vm143_vm2, %v144_v13, %v142_v16  ;;  %v156_v45 = vsel %vm155_vm0, %v2963_v48, %v154_v30 }
  0xc7   :  { %v2666_v29 = vpop.eup %2665  ;;  %v147_v31 = vmul.f32 %v2664_v24, %v2967_v52  ;;  %v251_v47 = vadd.f32 0.0001, %v145_v35  ;;  %vm192_vm0 = vcmp.eq.f32.partialorder %v2978_v59, 0.0  ;;  %vm199_vm2 = vcmp.eq.f32.partialorder %v2986_v4, 0.0 }
  0xc8   :  { %2679 = vrsqrt.f32 %v2998_v28  ;;  %v161_v42 = vmul.f32 %v2666_v29, %v2965_v51  ;;  %v159_v13 = vsel %vm157_vm3, %v158_v6, %v156_v45  ;;  %vm211_vm3 = vcmp.eq.f32.partialorder %v3003_v33, inf }
  0xc9   :  { %v2668_v36 = vpop.eup %2667  ;;  %v149_v37 = vsel %vm148_vm5, %v2967_v52, %v147_v31  ;;  %2681 = vrsqrt.f32 %v3003_v33  ;;  %v117_v39 = vpop.xlane.xlu1 %116  ;;  %vm213_vm5 = vcmp.eq.f32.partialorder %v3003_v33, 0.0  ;;  %v214_v29 = vand.u32 2147483648, %v3003_v33 }
  0xca   :  { %v115_v40 = vpop.xlane.xlu0 %114  ;;  %v2670_v41 = vpop.eup %2669  ;;  %v3019_v44 = vmul.f32 0.0078125, %v117_v39  ;;  %v152_v53 = vsel %vm150_vm6, %v151_v25, %v149_v37  ;;  %v175_v57 = vmul.f32 %v2668_v36, %v2972_v55  ;;  %v163_v7 = vsel %vm162_vm4, %v2965_v51, %v161_v42 }
  0xcb   :  { %v3026_v46 = vmul.f32 0.0078125, %v115_v40  ;;  %v168_v49 = vmul.f32 %v2670_v41, %v2974_v56  ;;  %vm218_vm6 = vcmp.eq.f32.partialorder %v2998_v28, inf  ;;  %v252_v21 = vadd.f32 0.0001, %v152_v53 }
  0xcc   :  { %2683 = vrsqrt.f32 %v3019_v44  ;;  %vm220_vm4 = vcmp.eq.f32.partialorder %v2998_v28, 0.0  ;;  %v221_v25 = vand.u32 2147483648, %v2998_v28  ;;  %v177_v6 = vsel %vm176_vm7, %v2972_v55, %v175_v57 }
  0xcd   :  { %v2672_v54 = vpop.eup %2671  ;;  %2685 = vrsqrt.f32 %v3026_v46  ;;  %v121_v61 = vpop.xlane.xlu1 %120  ;;  %v170_v24 = vsel %vm169_vm8, %v2974_v56, %v168_v49  ;;  %v235_v30 = vand.u32 2147483648, %v3019_v44  ;;  %vm232_vm7 = vcmp.eq.f32.partialorder %v3019_v44, inf }
  0xce   :  { %v119_v62 = vpop.xlane.xlu0 %118  ;;  %v2674_v63 = vpop.eup %2673  ;;  %v189_v52 = vmul.f32 %v2672_v54, %v2978_v59  ;;  %v3044_v12 = vmul.f32 0.0078125, %v121_v61  ;;  %2687 = vrcp.f32 %v251_v47  ;;  %v166_v40 = vsel %vm164_vm10, %v165_v17, %v163_v7 }
  0xcf   :  { %v182_v16 = vmul.f32 %v2674_v63, %v2980_v60  ;;  %v3053_v20 = vmul.f32 0.0078125, %v119_v62  ;;  %v253_v41 = vadd.f32 0.0001, %v159_v13  ;;  %v173_v42 = vsel %vm171_vm11, %v172_v34, %v170_v24 }
  0xd0   :  { %2689 = vrsqrt.f32 %v3044_v12  ;;  %v191_v35 = vsel %vm190_vm9, %v2978_v59, %v189_v52  ;;  %vm234_vm8 = vcmp.eq.f32.partialorder %v3019_v44, 0.0  ;;  %vm225_vm9 = vcmp.eq.f32.partialorder %v3026_v46, inf }
  0xd1   :  { %v2676_v48 = vpop.eup %2675  ;;  %2691 = vrsqrt.f32 %v3053_v20  ;;  %v184_v36 = vsel %vm183_vm12, %v2980_v60, %v182_v16  ;;  %v254_v47 = vadd.f32 0.0001, %v166_v40  ;;  %v180_v51 = vsel %vm178_vm13, %v179_v32, %v177_v6 }
  0xd2   :  { %v2678_v31 = vpop.eup %2677  ;;  %v203_v37 = vmul.f32 %v2676_v48, %v2984_v3  ;;  %2693 = vrcp.f32 %v252_v21  ;;  %v255_v17 = vadd.f32 0.0001, %v173_v42  ;;  %vm227_vm10 = vcmp.eq.f32.partialorder %v3026_v46, 0.0 }
  0xd3   :  { %v196_v39 = vmul.f32 %v2678_v31, %v2986_v4  ;;  %2695 = vrcp.f32 %v253_v41  ;;  %v256_v34 = vadd.f32 0.0001, %v180_v51  ;;  %v187_v53 = vsel %vm185_vm15, %v186_v43, %v184_v36 }
  0xd4   :  { %v205_v45 = vsel %vm204_vm14, %v2984_v3, %v203_v37  ;;  %2697 = vrcp.f32 %v254_v47  ;;  %v194_v55 = vsel %vm192_vm0, %v193_v38, %v191_v35  ;;  %v257_v32 = vadd.f32 0.0001, %v187_v53 }
  0xd5   :  { %v2680_v49 = vpop.eup %2679  ;;  %v198_v56 = vsel %vm197_vm1, %v2986_v4, %v196_v39  ;;  %2699 = vrcp.f32 %v255_v17  ;;  %v258_v62 = vadd.f32 0.0001, %v194_v55  ;;  %vm3322_vm11 = vcmp.eq.f32.partialorder %v2984_v3, 0.0 }
  0xd6   :  { %v2682_v54 = vpop.eup %2681  ;;  %v217_v57 = vmul.f32 %v2680_v49, %v2998_v28  ;;  %v201_v63 = vsel %vm199_vm2, %v200_v58, %v198_v56  ;;  %2701 = vrcp.f32 %v256_v34  ;;  %v208_v43 = vsel %vm3322_vm11, %v207_v50, %v205_v45 }
  0xd7   :  { %v210_v61 = vmul.f32 %v2682_v54, %v3003_v33  ;;  %v259_v59 = vadd.f32 0.0001, %v201_v63  ;;  %2703 = vrcp.f32 %v257_v32  ;;  %v260_v52 = vadd.f32 0.0001, %v208_v43 }
  0xd8   :  { %v219_v60 = vsel %vm218_vm6, %v2998_v28, %v217_v57  ;;  %v228_v16 = vand.u32 2147483648, %v3026_v46  ;;  %2705 = vrcp.f32 %v258_v62  ;;  %vm246_vm12 = vcmp.eq.f32.partialorder %v3044_v12, inf }
  0xd9   :  { %v2684_v38 = vpop.eup %2683  ;;  %v212_v7 = vsel %vm211_vm3, %v3003_v33, %v210_v61  ;;  %v222_v4 = vsel %vm220_vm4, %v221_v25, %v219_v60  ;;  %2707 = vrcp.f32 %v259_v59  ;;  %vm248_vm13 = vcmp.eq.f32.partialorder %v3044_v12, 0.0 }
  0xda   :  { %v2686_v58 = vpop.eup %2685  ;;  %v231_v13 = vmul.f32 %v2684_v38, %v3019_v44  ;;  %v215_v3 = vsel %vm213_vm5, %v214_v29, %v212_v7  ;;  %v262_v24 = vadd.f32 0.0001, %v222_v4  ;;  %2709 = vrcp.f32 %v260_v52 }
  0xdb   :  { %v224_v50 = vmul.f32 %v2686_v58, %v3026_v46  ;;  %v261_v21 = vadd.f32 0.0001, %v215_v3  ;;  %v2688_v48 = vpop.eup %2687  ;;  %v249_v6 = vand.u32 2147483648, %v3044_v12  ;;  %vm239_vm14 = vcmp.eq.f32.partialorder %v3053_v20, inf }
  0xdc   :  { %v233_v28 = vsel %vm232_vm7, %v3019_v44, %v231_v13  ;;  %v242_v41 = vand.u32 2147483648, %v3053_v20  ;;  %vm241_vm15 = vcmp.eq.f32.partialorder %v3053_v20, 0.0 }
  0xdd   :  { %v2690_v25 = vpop.eup %2689  ;;  %v226_v33 = vsel %vm225_vm9, %v3026_v46, %v224_v50  ;;  %v236_v29 = vsel %vm234_vm8, %v235_v30, %v233_v28  ;;  %2711 = vrcp.f32 %v261_v21  ;;  %v283_v30 = vmul.f32 %v2688_v48, %v2859_v1  ;;  %v2612_v48 = vld [vmem:[#allocation5 + $0x70] sm:$0xff]   ;;  %v2615_v28 = vld [vmem:[#allocation5 + $0x58] sm:$0xff]  }
  0xde   :  { %v2692_v31 = vpop.eup %2691  ;;  %v245_v35 = vmul.f32 %v2690_v25, %v3044_v12  ;;  %v229_v36 = vsel %vm227_vm10, %v228_v16, %v226_v33  ;;  %v264_v37 = vadd.f32 0.0001, %v236_v29  ;;  %2713 = vrcp.f32 %v262_v24  ;;  %v3170_v33 = vld [vmem:[#allocation7] ss:$0 sm:$0xff] }
  0xdf   :  { %v2694_v39 = vpop.eup %2693  ;;  %v238_v40 = vmul.f32 %v2692_v31, %v3053_v20  ;;  %v263_v42 = vadd.f32 0.0001, %v229_v36 }
  0xe0   :  { %v247_v44 = vsel %vm246_vm12, %v3044_v12, %v245_v35  ;;  %v284_v45 = vmul.f32 %v2694_v39, %v2873_v5  ;;  %2715 = vrcp.f32 %v264_v37  ;;  %v2696_v51 = vpop.eup %2695 }
  0xe1   :  { %v250_v46 = vsel %vm248_vm13, %v249_v6, %v247_v44  ;;  %v240_v47 = vsel %vm239_vm14, %v3053_v20, %v238_v40  ;;  %2717 = vrcp.f32 %v263_v42  ;;  %v2698_v56 = vpop.eup %2697  ;;  %v285_v5 = vmul.f32 %v2696_v51, %v2854_v0 }
  0xe2   :  { %v243_v17 = vsel %vm241_vm15, %v242_v41, %v240_v47  ;;  %v316_v49 = vpack.c.bf16 %v284_v45, %v283_v30  ;;  %v266_v34 = vadd.f32 0.0001, %v250_v46  ;;  %v2700_v53 = vpop.eup %2699  ;;  %v286_v12 = vmul.f32 %v2698_v56, %v2864_v2 }
  0xe3   :  { %v265_v1 = vadd.f32 0.0001, %v243_v17  ;;  %v2702_v54 = vpop.eup %2701  ;;  %v287_v57 = vmul.f32 %v2700_v53, %v2887_v9 }
  0xe4   :  { %2347 = vmatprep.mubr.bf16.mxu0 %v316_v49  ;;  %v2704_v55 = vpop.eup %2703  ;;  %v317_v32 = vpack.c.bf16 %v286_v12, %v285_v5  ;;  %v288_v20 = vmul.f32 %v2702_v54, %v2882_v8  ;;  %2719 = vrcp.f32 %v266_v34 }
  0xe5   :  { %v2706_v61 = vpop.eup %2705  ;;  %v289_v60 = vmul.f32 %v2704_v55, %v2897_v11  ;;  %2721 = vrcp.f32 %v265_v1 }
  0xe6   :  { %v2708_v62 = vpop.eup %2707  ;;  %2348 = vmatmul.mubr.bf16.vlgmr.msra.gmra.mxu0 %v317_v32  ;;  %v318_v63 = vpack.c.bf16 %v288_v20, %v287_v57  ;;  %v290_v43 = vmul.f32 %v2706_v61, %v2892_v10 }
  0xe7   :  { %v2710_v0 = vpop.eup %2709  ;;  %v291_v2 = vmul.f32 %v2708_v62, %v2911_v15 }
  0xe8   :  { %2351 = vmatprep.mubr.bf16.mxu0 %v318_v63  ;;  %v292_v9 = vmul.f32 %v2710_v0, %v2906_v14  ;;  %v319_v7 = vpack.c.bf16 %v290_v43, %v289_v60 }
  0xea   :  { %v2712_v59 = vpop.eup %2711  ;;  %v320_v52 = vpack.c.bf16 %v292_v9, %v291_v2 }
  0xeb   :  { %v2714_v38 = vpop.eup %2713  ;;  %v293_v58 = vmul.f32 %v2712_v59, %v2925_v19  ;;  %v2608_v19 = vld [vmem:[#allocation5 + $0x10] sm:$0xff]  }
  0xec   :  { %v294_v11 = vmul.f32 %v2714_v38, %v2920_v18  ;;  %2373 = vmatprep.subr.bf16.mxu1 %v2608_v19  ;;  %v2609_v18 = vld [vmem:[#allocation5 + $0x8] sm:$0xff]  }
  0xed   :  { %v2716_v8 = vpop.eup %2715  ;;  %2374 = vmatpush3.bf16.msra.mxu1 %v2608_v19 }
  0xee   :  { %v2718_v4 = vpop.eup %2717  ;;  %2352 = vmatmul.mubr.bf16.gmra.mxu0 %v319_v7  ;;  %v296_v13 = vmul.f32 %v2716_v8, %v2934_v22  ;;  %v321_v16 = vpack.c.bf16 %v294_v11, %v293_v58  ;;  %2375 = vmatprep.subr.bf16.mxu1 %v2609_v18  ;;  %v2611_v22 = vld [vmem:[#allocation5 + $0x78] sm:$0xff]  }
  0xef   :  { %2355 = vmatprep.mubr.bf16.mxu0 %v320_v52  ;;  %v295_v10 = vmul.f32 %v2718_v4, %v2939_v23  ;;  %v2610_v23 = vld [vmem:[#allocation5] sm:$0xff]   ;;  %2395 = vmatprep.subr.bf16.mxu0 %v2611_v22 }
  0xf0   :  { %2396 = vmatpush3.bf16.msra.mxu0 %v2611_v22 }
  0xf1   :  { %v2720_v15 = vpop.eup %2719  ;;  %v322_v14 = vpack.c.bf16 %v296_v13, %v295_v10  ;;  %2376 = vmatpush3.bf16.msra.mxu1 %v2609_v18  ;;  %2397 = vmatprep.subr.bf16.mxu0 %v2612_v48 }
  0xf2   :  { %v2722_v3 = vpop.eup %2721  ;;  %v298_v21 = vmul.f32 %v2720_v15, %v2948_v26  ;;  %2377 = vmatprep.subr.bf16.mxu1 %v2610_v23  ;;  %v2614_v26 = vld [vmem:[#allocation5 + $0x60] sm:$0xff]  }
  0xf3   :  { %v297_v50 = vmul.f32 %v2722_v3, %v2953_v27  ;;  %v2613_v27 = vld [vmem:[#allocation5 + $0x68] sm:$0xff]  }
  0xf4   :  { %2398 = vmatpush3.bf16.msra.mxu0 %v2612_v48 }
  0xf5   :  { %v323_v24 = vpack.c.bf16 %v298_v21, %v297_v50  ;;  %2378 = vmatpush3.bf16.msra.mxu1 %v2610_v23  ;;  %2399 = vmatprep.subr.bf16.mxu0 %v2613_v27 }
  0xf6   :  { %2356 = vmatmul.mubr.bf16.gmra.mxu0 %v321_v16 }
  0xf7   :  { %2359 = vmatprep.mubr.bf16.mxu0 %v322_v14 }
  0xf8   :  { %2400 = vmatpush3.bf16.msra.mxu0 %v2613_v27 }
  0xf9   :  { %2401 = vmatprep.subr.bf16.mxu0 %v2614_v26 }
  0xfc   :  { %2402 = vmatpush3.bf16.msra.mxu0 %v2614_v26 }
  0xfd   :  { %2403 = vmatprep.subr.bf16.mxu0 %v2615_v28 }
  0xfe   :  { %2360 = vmatmul.mubr.bf16.gmra.mxu0 %v323_v24 }
 0x100   :  { %2404 = vmatpush3.bf16.msra.mxu0 %v2615_v28 }
 0x1a6   :  { %v2349_v25 = vpop.f32.mrf.mxu0 }
 0x1a7   :  { %v419_v31 = vadd.f32 %v2349_v25, %v3170_v33 }
 0x1a8   :  { %v410_v6 = vpop.f32.mrf.mxu0 }
 0x1a9   :  { %v411_v29 = vadd.f32 %v3170_v33, %v410_v6  ;;  %v491_v42 = vmul.f32 0.2, %v419_v31  ;;  %vm475_vm2 = vcmp.ge.f32.partialorder %v419_v31, 0.0 }
 0x1aa   :  { %v2350_v35 = vpop.f32.mrf.mxu0 }
 0x1ab   :  { %v422_v36 = vadd.f32 %v2350_v35, %v3170_v33  ;;  %v489_v39 = vmul.f32 0.2, %v411_v29  ;;  %vm473_vm1 = vcmp.ge.f32.partialorder %v411_v29, 0.0  ;;  %v507_v53 = vsel %vm475_vm2, %v419_v31, %v491_v42  ;;  %v2617_v42 = vld [vmem:[#allocation5 + $0x48] sm:$0xff]  }
 0x1ac   :  { %v413_v37 = vpop.f32.mrf.mxu0 }
 0x1ad   :  { %vm476_vm0 = vcmp.ge.f32.partialorder %v422_v36, 0.0  ;;  %v492_v40 = vmul.f32 0.2, %v422_v36  ;;  %v414_v41 = vadd.f32 %v3170_v33, %v413_v37  ;;  %v505_v51 = vsel %vm473_vm1, %v411_v29, %v489_v39 }
 0x1ae   :  { %v2353_v44 = vpop.f32.mrf.mxu0 }
 0x1af   :  { %v490_v30 = vmul.f32 0.2, %v414_v41  ;;  %vm474_vm5 = vcmp.ge.f32.partialorder %v414_v41, 0.0  ;;  %v508_v46 = vsel %vm476_vm0, %v422_v36, %v492_v40  ;;  %v435_v49 = vadd.f32 %v2353_v44, %v3170_v33  ;;  %v2619_v44 = vld [vmem:[#allocation5 + $0xb8] sm:$0xff]  }
 0x1b0   :  { %v426_v45 = vpop.f32.mrf.mxu0  ;;  %v539_v5 = vpack.c.bf16 %v508_v46, %v507_v53  ;;  %2427 = vmatprep.subr.bf16.mxu1 %v2619_v44  ;;  %v2622_v46 = vld [vmem:[#allocation5 + $0xa0] sm:$0xff]  }
 0x1b1   :  { %v427_v47 = vadd.f32 %v3170_v33, %v426_v45  ;;  %v506_v17 = vsel %vm474_vm5, %v414_v41, %v490_v30  ;;  %v495_v32 = vmul.f32 0.2, %v435_v49  ;;  %vm479_vm3 = vcmp.ge.f32.partialorder %v435_v49, 0.0  ;;  %v2616_v41 = vld [vmem:[#allocation5 + $0x50] sm:$0xff]   ;;  %v2621_v45 = vld [vmem:[#allocation5 + $0xa8] sm:$0xff]  }
 0x1b2   :  { %v2354_v56 = vpop.f32.mrf.mxu0  ;;  %v538_v34 = vpack.c.bf16 %v506_v17, %v505_v51  ;;  %2405 = vmatprep.subr.bf16.mxu0 %v2616_v41  ;;  %v2620_v30 = vld [vmem:[#allocation5 + $0xb0] sm:$0xff]   ;;  %v3188_v17 = vld [vmem:[#allocation7 + $0x1] ss:$0 sm:$0xff] }
 0x1b3   :  { %v438_v1 = vadd.f32 %v2354_v56, %v3170_v33  ;;  %v493_v54 = vmul.f32 0.2, %v427_v47  ;;  %vm477_vm4 = vcmp.ge.f32.partialorder %v427_v47, 0.0  ;;  %v511_v38 = vsel %vm479_vm3, %v435_v49, %v495_v32  ;;  %2406 = vmatpush3.bf16.msra.mxu0 %v2616_v41 }
 0x1b4   :  { %v429_v12 = vpop.f32.mrf.mxu0  ;;  %2379 = vmatprep.mubr.bf16.mxu1 %v538_v34  ;;  %2407 = vmatprep.subr.bf16.mxu0 %v2617_v42 }
 0x1b5   :  { %vm480_vm6 = vcmp.ge.f32.partialorder %v438_v1, 0.0  ;;  %v496_v57 = vmul.f32 0.2, %v438_v1  ;;  %v430_v55 = vadd.f32 %v3170_v33, %v429_v12  ;;  %2380 = vmatmul.mubr.bf16.vlgmr.msra.gmra.mxu1 %v539_v5  ;;  %v509_v43 = vsel %vm477_vm4, %v427_v47, %v493_v54  ;;  %v2623_v47 = vld [vmem:[#allocation5 + $0x98] sm:$0xff]  }
 0x1b6   :  { %v2357_v20 = vpop.f32.mrf.mxu0  ;;  %2428 = vmatpush3.bf16.msra.mxu1 %v2619_v44 }
 0x1b7   :  { %vm478_vm7 = vcmp.ge.f32.partialorder %v430_v55, 0.0  ;;  %v494_v61 = vmul.f32 0.2, %v430_v55  ;;  %v512_v63 = vsel %vm480_vm6, %v438_v1, %v496_v57  ;;  %v451_v2 = vadd.f32 %v2357_v20, %v3170_v33  ;;  %2408 = vmatpush3.bf16.msra.mxu0 %v2617_v42  ;;  %2429 = vmatprep.subr.bf16.mxu1 %v2620_v30 }
 0x1b8   :  { %v442_v62 = vpop.f32.mrf.mxu0  ;;  %v541_v8 = vpack.c.bf16 %v512_v63, %v511_v38 }
 0x1b9   :  { %v443_v60 = vadd.f32 %v3170_v33, %v442_v62  ;;  %v510_v0 = vsel %vm478_vm7, %v430_v55, %v494_v61  ;;  %v499_v10 = vmul.f32 0.2, %v451_v2  ;;  %vm483_vm10 = vcmp.ge.f32.partialorder %v451_v2, 0.0 }
 0x1ba   :  { %v2358_v9 = vpop.f32.mrf.mxu0  ;;  %v540_v59 = vpack.c.bf16 %v510_v0, %v509_v43  ;;  %2430 = vmatpush3.bf16.msra.mxu1 %v2620_v30 }
 0x1bb   :  { %v454_v7 = vadd.f32 %v2358_v9, %v3170_v33  ;;  %v497_v4 = vmul.f32 0.2, %v443_v60  ;;  %vm481_vm9 = vcmp.ge.f32.partialorder %v443_v60, 0.0  ;;  %v515_v23 = vsel %vm483_vm10, %v451_v2, %v499_v10  ;;  %2431 = vmatprep.subr.bf16.mxu1 %v2621_v45 }
 0x1bc   :  { %v445_v52 = vpop.f32.mrf.mxu0  ;;  %2383 = vmatprep.mubr.bf16.mxu1 %v540_v59 }
 0x1bd   :  { %vm484_vm8 = vcmp.ge.f32.partialorder %v454_v7, 0.0  ;;  %v500_v58 = vmul.f32 0.2, %v454_v7  ;;  %v446_v11 = vadd.f32 %v3170_v33, %v445_v52  ;;  %2384 = vmatmul.mubr.bf16.gmra.mxu1 %v541_v8  ;;  %v513_v50 = vsel %vm481_vm9, %v443_v60, %v497_v4 }
 0x1be   :  { %v2361_v13 = vpop.f32.mrf.mxu0  ;;  %2432 = vmatpush3.bf16.msra.mxu1 %v2621_v45 }
 0x1bf   :  { %vm482_vm11 = vcmp.ge.f32.partialorder %v446_v11, 0.0  ;;  %v498_v15 = vmul.f32 0.2, %v446_v11  ;;  %v516_v3 = vsel %vm484_vm8, %v454_v7, %v500_v58  ;;  %v467_v24 = vadd.f32 %v2361_v13, %v3170_v33  ;;  %2433 = vmatprep.subr.bf16.mxu1 %v2622_v46 }
 0x1c0   :  { %v458_v16 = vpop.f32.mrf.mxu0  ;;  %v543_v48 = vpack.c.bf16 %v516_v3, %v515_v23 }
 0x1c1   :  { %v459_v14 = vadd.f32 %v3170_v33, %v458_v16  ;;  %v514_v21 = vsel %vm482_vm11, %v446_v11, %v498_v15  ;;  %v503_v6 = vmul.f32 0.2, %v467_v24  ;;  %vm487_vm14 = vcmp.ge.f32.partialorder %v467_v24, 0.0 }
 0x1c2   :  { %v2362_v19 = vpop.f32.mrf.mxu0  ;;  %v542_v18 = vpack.c.bf16 %v514_v21, %v513_v50  ;;  %2434 = vmatpush3.bf16.msra.mxu1 %v2622_v46 }
 0x1c3   :  { %v470_v22 = vadd.f32 %v2362_v19, %v3170_v33  ;;  %v501_v26 = vmul.f32 0.2, %v459_v14  ;;  %vm485_vm13 = vcmp.ge.f32.partialorder %v459_v14, 0.0  ;;  %v519_v39 = vsel %vm487_vm14, %v467_v24, %v503_v6  ;;  %2435 = vmatprep.subr.bf16.mxu1 %v2623_v47 }
 0x1c4   :  { %v461_v27 = vpop.f32.mrf.mxu0  ;;  %2387 = vmatprep.mubr.bf16.mxu1 %v542_v18 }
 0x1c5   :  { %vm488_vm12 = vcmp.ge.f32.partialorder %v470_v22, 0.0  ;;  %v504_v28 = vmul.f32 0.2, %v470_v22  ;;  %v462_v25 = vadd.f32 %v3170_v33, %v461_v27  ;;  %2388 = vmatmul.mubr.bf16.gmra.mxu1 %v543_v48  ;;  %v517_v35 = vsel %vm485_vm13, %v459_v14, %v501_v26  ;;  %v2618_v33 = vld [vmem:[#allocation5 + $0x40] sm:$0xff]  }
 0x1c6   :  { %2409 = vmatprep.subr.bf16.mxu0 %v2618_v33  ;;  %2436 = vmatpush3.bf16.msra.mxu1 %v2623_v47 }
 0x1c7   :  { %vm486_vm15 = vcmp.ge.f32.partialorder %v462_v25, 0.0  ;;  %v502_v29 = vmul.f32 0.2, %v462_v25  ;;  %v520_v31 = vsel %vm488_vm12, %v470_v22, %v504_v28  ;;  %2410 = vmatpush3.bf16.msra.mxu0 %v2618_v33 }
 0x1c8   :  { %v545_v40 = vpack.c.bf16 %v520_v31, %v519_v39 }
 0x1c9   :  { %v518_v36 = vsel %vm486_vm15, %v462_v25, %v502_v29 }
 0x1ca   :  { %v544_v37 = vpack.c.bf16 %v518_v36, %v517_v35 }
 0x1cc   :  { %2391 = vmatprep.mubr.bf16.mxu1 %v544_v37 }
 0x1cd   :  { %2392 = vmatmul.mubr.bf16.gmra.mxu1 %v545_v40 }
 0x275   :  { %v2381_v51 = vpop.f32.mrf.mxu1 }
 0x276   :  { %v641_v34 = vadd.f32 %v2381_v51, %v3188_v17 }
 0x277   :  { %v632_v49 = vpop.f32.mrf.mxu1 }
 0x278   :  { %v633_v56 = vadd.f32 %v3188_v17, %v632_v49  ;;  %v713_v55 = vmul.f32 0.2, %v641_v34  ;;  %vm697_vm2 = vcmp.ge.f32.partialorder %v641_v34, 0.0 }
 0x279   :  { %v2382_v53 = vpop.f32.mrf.mxu1 }
 0x27a   :  { %v644_v1 = vadd.f32 %v2382_v53, %v3188_v17  ;;  %v711_v12 = vmul.f32 0.2, %v633_v56  ;;  %vm695_vm1 = vcmp.ge.f32.partialorder %v633_v56, 0.0  ;;  %v729_v0 = vsel %vm697_vm2, %v641_v34, %v713_v55  ;;  %v2625_v55 = vld [vmem:[#allocation5 + $0x88] sm:$0xff]  }
 0x27b   :  { %v635_v5 = vpop.f32.mrf.mxu1 }
 0x27c   :  { %vm698_vm0 = vcmp.ge.f32.partialorder %v644_v1, 0.0  ;;  %v714_v54 = vmul.f32 0.2, %v644_v1  ;;  %v636_v57 = vadd.f32 %v3188_v17, %v635_v5  ;;  %v727_v60 = vsel %vm695_vm1, %v633_v56, %v711_v12 }
 0x27d   :  { %v2385_v32 = vpop.f32.mrf.mxu1 }
 0x27e   :  { %vm696_vm5 = vcmp.ge.f32.partialorder %v636_v57, 0.0  ;;  %v712_v20 = vmul.f32 0.2, %v636_v57  ;;  %v730_v61 = vsel %vm698_vm0, %v644_v1, %v714_v54  ;;  %v657_v2 = vadd.f32 %v2385_v32, %v3188_v17  ;;  %v2627_v32 = vld [vmem:[#allocation5 + $0xf8] sm:$0xff]  }
 0x27f   :  { %v648_v62 = vpop.f32.mrf.mxu1  ;;  %v762_v38 = vpack.c.bf16 %v730_v61, %v729_v0  ;;  %2459 = vmatprep.subr.bf16.mxu0 %v2627_v32  ;;  %v2629_v61 = vld [vmem:[#allocation5 + $0xe8] sm:$0xff]  }
 0x280   :  { %v649_v63 = vadd.f32 %v3188_v17, %v648_v62  ;;  %v728_v43 = vsel %vm696_vm5, %v636_v57, %v712_v20  ;;  %v717_v11 = vmul.f32 0.2, %v657_v2  ;;  %vm701_vm3 = vcmp.ge.f32.partialorder %v657_v2, 0.0  ;;  %v2624_v57 = vld [vmem:[#allocation5 + $0x90] sm:$0xff]   ;;  %v2630_v62 = vld [vmem:[#allocation5 + $0xe0] sm:$0xff]  }
 0x281   :  { %v2386_v9 = vpop.f32.mrf.mxu1  ;;  %v761_v59 = vpack.c.bf16 %v728_v43, %v727_v60  ;;  %2437 = vmatprep.subr.bf16.mxu1 %v2624_v57  ;;  %v2628_v20 = vld [vmem:[#allocation5 + $0xf0] sm:$0xff]   ;;  %v3206_v43 = vld [vmem:[#allocation7 + $0x2] ss:$0 sm:$0xff] }
 0x282   :  { %v660_v7 = vadd.f32 %v2386_v9, %v3188_v17  ;;  %v715_v52 = vmul.f32 0.2, %v649_v63  ;;  %vm699_vm4 = vcmp.ge.f32.partialorder %v649_v63, 0.0  ;;  %v733_v18 = vsel %vm701_vm3, %v657_v2, %v717_v11  ;;  %2438 = vmatpush3.bf16.msra.mxu1 %v2624_v57 }
 0x283   :  { %v651_v8 = vpop.f32.mrf.mxu1  ;;  %2411 = vmatprep.mubr.bf16.mxu0 %v761_v59  ;;  %2439 = vmatprep.subr.bf16.mxu1 %v2625_v55 }
 0x284   :  { %vm702_vm6 = vcmp.ge.f32.partialorder %v660_v7, 0.0  ;;  %v718_v4 = vmul.f32 0.2, %v660_v7  ;;  %v652_v58 = vadd.f32 %v3188_v17, %v651_v8  ;;  %2412 = vmatmul.mubr.bf16.vlgmr.msra.gmra.mxu0 %v762_v38  ;;  %v731_v14 = vsel %vm699_vm4, %v649_v63, %v715_v52  ;;  %v2631_v63 = vld [vmem:[#allocation5 + $0xd8] sm:$0xff]  }
 0x285   :  { %v2389_v10 = vpop.f32.mrf.mxu1  ;;  %2460 = vmatpush3.bf16.msra.mxu0 %v2627_v32 }
 0x286   :  { %vm700_vm7 = vcmp.ge.f32.partialorder %v652_v58, 0.0  ;;  %v716_v13 = vmul.f32 0.2, %v652_v58  ;;  %v734_v16 = vsel %vm702_vm6, %v660_v7, %v718_v4  ;;  %v673_v21 = vadd.f32 %v2389_v10, %v3188_v17  ;;  %2440 = vmatpush3.bf16.msra.mxu1 %v2625_v55  ;;  %2461 = vmatprep.subr.bf16.mxu0 %v2628_v20 }
 0x287   :  { %v664_v15 = vpop.f32.mrf.mxu1  ;;  %v764_v22 = vpack.c.bf16 %v734_v16, %v733_v18 }
 0x288   :  { %v665_v3 = vadd.f32 %v3188_v17, %v664_v15  ;;  %v732_v50 = vsel %vm700_vm7, %v652_v58, %v716_v13  ;;  %v721_v25 = vmul.f32 0.2, %v673_v21  ;;  %vm705_vm10 = vcmp.ge.f32.partialorder %v673_v21, 0.0 }
 0x289   :  { %v2390_v24 = vpop.f32.mrf.mxu1  ;;  %v763_v19 = vpack.c.bf16 %v732_v50, %v731_v14  ;;  %2462 = vmatpush3.bf16.msra.mxu0 %v2628_v20 }
 0x28a   :  { %v676_v23 = vadd.f32 %v2390_v24, %v3188_v17  ;;  %v719_v27 = vmul.f32 0.2, %v665_v3  ;;  %vm703_vm9 = vcmp.ge.f32.partialorder %v665_v3, 0.0  ;;  %v737_v33 = vsel %vm705_vm10, %v673_v21, %v721_v25  ;;  %2463 = vmatprep.subr.bf16.mxu0 %v2629_v61 }
 0x28b   :  { %v667_v48 = vpop.f32.mrf.mxu1  ;;  %2415 = vmatprep.mubr.bf16.mxu0 %v763_v19 }
 0x28c   :  { %vm706_vm8 = vcmp.ge.f32.partialorder %v676_v23, 0.0  ;;  %v722_v26 = vmul.f32 0.2, %v676_v23  ;;  %v668_v28 = vadd.f32 %v3188_v17, %v667_v48  ;;  %2416 = vmatmul.mubr.bf16.gmra.mxu0 %v764_v22  ;;  %v735_v37 = vsel %vm703_vm9, %v665_v3, %v719_v27 }
 0x28d   :  { %v2393_v6 = vpop.f32.mrf.mxu1  ;;  %2464 = vmatpush3.bf16.msra.mxu0 %v2629_v61 }
 0x28e   :  { %vm704_vm11 = vcmp.ge.f32.partialorder %v668_v28, 0.0  ;;  %v720_v29 = vmul.f32 0.2, %v668_v28  ;;  %v738_v35 = vsel %vm706_vm8, %v676_v23, %v722_v26  ;;  %v689_v40 = vadd.f32 %v2393_v6, %v3188_v17  ;;  %2465 = vmatprep.subr.bf16.mxu0 %v2630_v62 }
 0x28f   :  { %v680_v31 = vpop.f32.mrf.mxu1  ;;  %v766_v30 = vpack.c.bf16 %v738_v35, %v737_v33 }
 0x290   :  { %v681_v36 = vadd.f32 %v3188_v17, %v680_v31  ;;  %v736_v39 = vsel %vm704_vm11, %v668_v28, %v720_v29  ;;  %v725_v49 = vmul.f32 0.2, %v689_v40  ;;  %vm709_vm14 = vcmp.ge.f32.partialorder %v689_v40, 0.0 }
 0x291   :  { %v2394_v41 = vpop.f32.mrf.mxu1  ;;  %v765_v42 = vpack.c.bf16 %v736_v39, %v735_v37  ;;  %2466 = vmatpush3.bf16.msra.mxu0 %v2630_v62 }
 0x292   :  { %v692_v44 = vadd.f32 %v2394_v41, %v3188_v17  ;;  %v723_v46 = vmul.f32 0.2, %v681_v36  ;;  %vm707_vm13 = vcmp.ge.f32.partialorder %v681_v36, 0.0  ;;  %v741_v12 = vsel %vm709_vm14, %v689_v40, %v725_v49  ;;  %2467 = vmatprep.subr.bf16.mxu0 %v2631_v63 }
 0x293   :  { %v683_v45 = vpop.f32.mrf.mxu1  ;;  %2419 = vmatprep.mubr.bf16.mxu0 %v765_v42 }
 0x294   :  { %vm710_vm12 = vcmp.ge.f32.partialorder %v692_v44, 0.0  ;;  %v726_v47 = vmul.f32 0.2, %v692_v44  ;;  %v684_v51 = vadd.f32 %v3188_v17, %v683_v45  ;;  %2420 = vmatmul.mubr.bf16.gmra.mxu0 %v766_v30  ;;  %v739_v53 = vsel %vm707_vm13, %v681_v36, %v723_v46  ;;  %v2626_v17 = vld [vmem:[#allocation5 + $0x80] sm:$0xff]  }
 0x295   :  { %2441 = vmatprep.subr.bf16.mxu1 %v2626_v17  ;;  %2468 = vmatpush3.bf16.msra.mxu0 %v2631_v63 }
 0x296   :  { %vm708_vm15 = vcmp.ge.f32.partialorder %v684_v51, 0.0  ;;  %v724_v56 = vmul.f32 0.2, %v684_v51  ;;  %v742_v34 = vsel %vm710_vm12, %v692_v44, %v726_v47  ;;  %2442 = vmatpush3.bf16.msra.mxu1 %v2626_v17 }
 0x297   :  { %v768_v54 = vpack.c.bf16 %v742_v34, %v741_v12 }
 0x298   :  { %v740_v1 = vsel %vm708_vm15, %v684_v51, %v724_v56 }
 0x299   :  { %v767_v5 = vpack.c.bf16 %v740_v1, %v739_v53 }
 0x29b   :  { %2423 = vmatprep.mubr.bf16.mxu0 %v767_v5 }
 0x29c   :  { %2424 = vmatmul.mubr.bf16.gmra.mxu0 %v768_v54 }
 0x344   :  { %v2413_v60 = vpop.f32.mrf.mxu0 }
 0x345   :  { %v864_v9 = vadd.f32 %v2413_v60, %v3206_v43 }
 0x346   :  { %v855_v0 = vpop.f32.mrf.mxu0 }
 0x347   :  { %v856_v2 = vadd.f32 %v3206_v43, %v855_v0  ;;  %v936_v58 = vmul.f32 0.2, %v864_v9  ;;  %vm920_vm2 = vcmp.ge.f32.partialorder %v864_v9, 0.0 }
 0x348   :  { %v2414_v59 = vpop.f32.mrf.mxu0 }
 0x349   :  { %v867_v38 = vadd.f32 %v2414_v59, %v3206_v43  ;;  %v934_v8 = vmul.f32 0.2, %v856_v2  ;;  %vm918_vm1 = vcmp.ge.f32.partialorder %v856_v2, 0.0  ;;  %v952_v50 = vsel %vm920_vm2, %v864_v9, %v936_v58  ;;  %v2633_v58 = vld [vmem:[#allocation5 + $0xc8] sm:$0xff]  }
 0x34a   :  { %v858_v7 = vpop.f32.mrf.mxu0 }
 0x34b   :  { %vm921_vm0 = vcmp.ge.f32.partialorder %v867_v38, 0.0  ;;  %v937_v52 = vmul.f32 0.2, %v867_v38  ;;  %v859_v4 = vadd.f32 %v3206_v43, %v858_v7  ;;  %v950_v3 = vsel %vm918_vm1, %v856_v2, %v934_v8 }
 0x34c   :  { %v2417_v11 = vpop.f32.mrf.mxu0 }
 0x34d   :  { %vm919_vm5 = vcmp.ge.f32.partialorder %v859_v4, 0.0  ;;  %v935_v10 = vmul.f32 0.2, %v859_v4  ;;  %v953_v13 = vsel %vm921_vm0, %v867_v38, %v937_v52  ;;  %v880_v21 = vadd.f32 %v2417_v11, %v3206_v43  ;;  %v2635_v11 = vld [vmem:[#allocation5 + $0x138] sm:$0xff]  }
 0x34e   :  { %v871_v15 = vpop.f32.mrf.mxu0  ;;  %v985_v18 = vpack.c.bf16 %v953_v13, %v952_v50  ;;  %2491 = vmatprep.subr.bf16.mxu1 %v2635_v11  ;;  %v2637_v13 = vld [vmem:[#allocation5 + $0x128] sm:$0xff]  }
 0x34f   :  { %v872_v16 = vadd.f32 %v3206_v43, %v871_v15  ;;  %v951_v14 = vsel %vm919_vm5, %v859_v4, %v935_v10  ;;  %v940_v28 = vmul.f32 0.2, %v880_v21  ;;  %vm924_vm3 = vcmp.ge.f32.partialorder %v880_v21, 0.0  ;;  %v2632_v4 = vld [vmem:[#allocation5 + $0xd0] sm:$0xff]   ;;  %v2638_v15 = vld [vmem:[#allocation5 + $0x120] sm:$0xff]  }
 0x350   :  { %v2418_v24 = vpop.f32.mrf.mxu0  ;;  %v984_v19 = vpack.c.bf16 %v951_v14, %v950_v3  ;;  %2469 = vmatprep.subr.bf16.mxu0 %v2632_v4  ;;  %v2636_v10 = vld [vmem:[#allocation5 + $0x130] sm:$0xff]   ;;  %v3224_v14 = vld [vmem:[#allocation7 + $0x3] ss:$0 sm:$0xff] }
 0x351   :  { %v883_v23 = vadd.f32 %v2418_v24, %v3206_v43  ;;  %v938_v48 = vmul.f32 0.2, %v872_v16  ;;  %vm922_vm4 = vcmp.ge.f32.partialorder %v872_v16, 0.0  ;;  %v956_v42 = vsel %vm924_vm3, %v880_v21, %v940_v28  ;;  %2470 = vmatpush3.bf16.msra.mxu0 %v2632_v4 }
 0x352   :  { %v874_v22 = vpop.f32.mrf.mxu0  ;;  %2443 = vmatprep.mubr.bf16.mxu1 %v984_v19  ;;  %2471 = vmatprep.subr.bf16.mxu0 %v2633_v58 }
 0x353   :  { %vm925_vm6 = vcmp.ge.f32.partialorder %v883_v23, 0.0  ;;  %v941_v27 = vmul.f32 0.2, %v883_v23  ;;  %v875_v26 = vadd.f32 %v3206_v43, %v874_v22  ;;  %2444 = vmatmul.mubr.bf16.vlgmr.msra.gmra.mxu1 %v985_v18  ;;  %v954_v36 = vsel %vm922_vm4, %v872_v16, %v938_v48  ;;  %v2639_v16 = vld [vmem:[#allocation5 + $0x118] sm:$0xff]  }
 0x354   :  { %v2421_v25 = vpop.f32.mrf.mxu0  ;;  %2492 = vmatpush3.bf16.msra.mxu1 %v2635_v11 }
 0x355   :  { %vm923_vm7 = vcmp.ge.f32.partialorder %v875_v26, 0.0  ;;  %v939_v6 = vmul.f32 0.2, %v875_v26  ;;  %v957_v31 = vsel %vm925_vm6, %v883_v23, %v941_v27  ;;  %v896_v39 = vadd.f32 %v2421_v25, %v3206_v43  ;;  %2472 = vmatpush3.bf16.msra.mxu0 %v2633_v58  ;;  %2493 = vmatprep.subr.bf16.mxu1 %v2636_v10 }
 0x356   :  { %v887_v29 = vpop.f32.mrf.mxu0  ;;  %v987_v44 = vpack.c.bf16 %v957_v31, %v956_v42 }
 0x357   :  { %v888_v35 = vadd.f32 %v3206_v43, %v887_v29  ;;  %v955_v37 = vsel %vm923_vm7, %v875_v26, %v939_v6  ;;  %v944_v51 = vmul.f32 0.2, %v896_v39  ;;  %vm928_vm10 = vcmp.ge.f32.partialorder %v896_v39, 0.0 }
 0x358   :  { %v2422_v40 = vpop.f32.mrf.mxu0  ;;  %v986_v41 = vpack.c.bf16 %v955_v37, %v954_v36  ;;  %2494 = vmatpush3.bf16.msra.mxu1 %v2636_v10 }
 0x359   :  { %v899_v33 = vadd.f32 %v2422_v40, %v3206_v43  ;;  %v942_v45 = vmul.f32 0.2, %v888_v35  ;;  %vm926_vm9 = vcmp.ge.f32.partialorder %v888_v35, 0.0  ;;  %v960_v17 = vsel %vm928_vm10, %v896_v39, %v944_v51  ;;  %2495 = vmatprep.subr.bf16.mxu1 %v2637_v13 }
 0x35a   :  { %v890_v30 = vpop.f32.mrf.mxu0  ;;  %2447 = vmatprep.mubr.bf16.mxu1 %v986_v41 }
 0x35b   :  { %vm929_vm8 = vcmp.ge.f32.partialorder %v899_v33, 0.0  ;;  %v945_v46 = vmul.f32 0.2, %v899_v33  ;;  %v891_v47 = vadd.f32 %v3206_v43, %v890_v30  ;;  %2448 = vmatmul.mubr.bf16.gmra.mxu1 %v987_v44  ;;  %v958_v5 = vsel %vm926_vm9, %v888_v35, %v942_v45 }
 0x35c   :  { %v2425_v49 = vpop.f32.mrf.mxu0  ;;  %2496 = vmatpush3.bf16.msra.mxu1 %v2637_v13 }
 0x35d   :  { %vm927_vm11 = vcmp.ge.f32.partialorder %v891_v47, 0.0  ;;  %v943_v56 = vmul.f32 0.2, %v891_v47  ;;  %v961_v53 = vsel %vm929_vm8, %v899_v33, %v945_v46  ;;  %v912_v54 = vadd.f32 %v2425_v49, %v3206_v43  ;;  %2497 = vmatprep.subr.bf16.mxu1 %v2638_v15 }
 0x35e   :  { %v903_v34 = vpop.f32.mrf.mxu0  ;;  %v989_v20 = vpack.c.bf16 %v961_v53, %v960_v17 }
 0x35f   :  { %v904_v1 = vadd.f32 %v3206_v43, %v903_v34  ;;  %v959_v12 = vsel %vm927_vm11, %v891_v47, %v943_v56  ;;  %v948_v0 = vmul.f32 0.2, %v912_v54  ;;  %vm932_vm14 = vcmp.ge.f32.partialorder %v912_v54, 0.0 }
 0x360   :  { %v2426_v57 = vpop.f32.mrf.mxu0  ;;  %v988_v55 = vpack.c.bf16 %v959_v12, %v958_v5  ;;  %2498 = vmatpush3.bf16.msra.mxu1 %v2638_v15 }
 0x361   :  { %v915_v32 = vadd.f32 %v2426_v57, %v3206_v43  ;;  %v946_v62 = vmul.f32 0.2, %v904_v1  ;;  %vm930_vm13 = vcmp.ge.f32.partialorder %v904_v1, 0.0  ;;  %v964_v8 = vsel %vm932_vm14, %v912_v54, %v948_v0  ;;  %2499 = vmatprep.subr.bf16.mxu1 %v2639_v16 }
 0x362   :  { %v906_v61 = vpop.f32.mrf.mxu0  ;;  %2451 = vmatprep.mubr.bf16.mxu1 %v988_v55 }
 0x363   :  { %vm933_vm12 = vcmp.ge.f32.partialorder %v915_v32, 0.0  ;;  %v949_v63 = vmul.f32 0.2, %v915_v32  ;;  %v907_v60 = vadd.f32 %v3206_v43, %v906_v61  ;;  %2452 = vmatmul.mubr.bf16.gmra.mxu1 %v989_v20  ;;  %v962_v59 = vsel %vm930_vm13, %v904_v1, %v946_v62  ;;  %v2634_v43 = vld [vmem:[#allocation5 + $0xc0] sm:$0xff]  }
 0x364   :  { %2473 = vmatprep.subr.bf16.mxu0 %v2634_v43  ;;  %2500 = vmatpush3.bf16.msra.mxu1 %v2639_v16 }
 0x365   :  { %vm931_vm15 = vcmp.ge.f32.partialorder %v907_v60, 0.0  ;;  %v947_v2 = vmul.f32 0.2, %v907_v60  ;;  %v965_v9 = vsel %vm933_vm12, %v915_v32, %v949_v63  ;;  %2474 = vmatpush3.bf16.msra.mxu0 %v2634_v43 }
 0x366   :  { %v991_v52 = vpack.c.bf16 %v965_v9, %v964_v8 }
 0x367   :  { %v963_v38 = vsel %vm931_vm15, %v907_v60, %v947_v2 }
 0x368   :  { %v990_v7 = vpack.c.bf16 %v963_v38, %v962_v59 }
 0x36a   :  { %2455 = vmatprep.mubr.bf16.mxu1 %v990_v7 }
 0x36b   :  { %2456 = vmatmul.mubr.bf16.gmra.mxu1 %v991_v52 }
 0x413   :  { %v2445_v3 = vpop.f32.mrf.mxu1 }
 0x414   :  { %v1087_v24 = vadd.f32 %v2445_v3, %v3224_v14 }
 0x415   :  { %v1078_v50 = vpop.f32.mrf.mxu1 }
 0x416   :  { %v1079_v21 = vadd.f32 %v3224_v14, %v1078_v50  ;;  %v1159_v26 = vmul.f32 0.2, %v1087_v24  ;;  %vm1143_vm2 = vcmp.ge.f32.partialorder %v1087_v24, 0.0 }
 0x417   :  { %v2446_v19 = vpop.f32.mrf.mxu1 }
 0x418   :  { %v1090_v18 = vadd.f32 %v2446_v19, %v3224_v14  ;;  %v1157_v22 = vmul.f32 0.2, %v1079_v21  ;;  %vm1141_vm1 = vcmp.ge.f32.partialorder %v1079_v21, 0.0  ;;  %v1175_v37 = vsel %vm1143_vm2, %v1087_v24, %v1159_v26  ;;  %v2641_v26 = vld [vmem:[#allocation5 + $0x108] sm:$0xff]  }
 0x419   :  { %v1081_v23 = vpop.f32.mrf.mxu1 }
 0x41a   :  { %vm1144_vm0 = vcmp.ge.f32.partialorder %v1090_v18, 0.0  ;;  %v1160_v48 = vmul.f32 0.2, %v1090_v18  ;;  %v1082_v27 = vadd.f32 %v3224_v14, %v1081_v23  ;;  %v1173_v35 = vsel %vm1141_vm1, %v1079_v21, %v1157_v22 }
 0x41b   :  { %v2449_v28 = vpop.f32.mrf.mxu1 }
 0x41c   :  { %vm1142_vm5 = vcmp.ge.f32.partialorder %v1082_v27, 0.0  ;;  %v1158_v25 = vmul.f32 0.2, %v1082_v27  ;;  %v1176_v6 = vsel %vm1144_vm0, %v1090_v18, %v1160_v48  ;;  %v1103_v39 = vadd.f32 %v2449_v28, %v3224_v14  ;;  %v2643_v28 = vld [vmem:[#allocation5 + $0x178] sm:$0xff]  }
 0x41d   :  { %v1094_v29 = vpop.f32.mrf.mxu1  ;;  %v1208_v42 = vpack.c.bf16 %v1176_v6, %v1175_v37  ;;  %2523 = vmatprep.subr.bf16.mxu0 %v2643_v28  ;;  %v2645_v6 = vld [vmem:[#allocation5 + $0x168] sm:$0xff]  }
 0x41e   :  { %v1095_v31 = vadd.f32 %v3224_v14, %v1094_v29  ;;  %v1174_v36 = vsel %vm1142_vm5, %v1082_v27, %v1158_v25  ;;  %v1163_v47 = vmul.f32 0.2, %v1103_v39  ;;  %vm1147_vm3 = vcmp.ge.f32.partialorder %v1103_v39, 0.0  ;;  %v2640_v27 = vld [vmem:[#allocation5 + $0x110] sm:$0xff]   ;;  %v2646_v29 = vld [vmem:[#allocation5 + $0x160] sm:$0xff]  }
 0x41f   :  { %v2450_v40 = vpop.f32.mrf.mxu1  ;;  %v1207_v41 = vpack.c.bf16 %v1174_v36, %v1173_v35  ;;  %2501 = vmatprep.subr.bf16.mxu1 %v2640_v27  ;;  %v2644_v25 = vld [vmem:[#allocation5 + $0x170] sm:$0xff]   ;;  %v3242_v36 = vld [vmem:[#allocation7 + $0x4] ss:$0 sm:$0xff] }
 0x420   :  { %v1106_v33 = vadd.f32 %v2450_v40, %v3224_v14  ;;  %v1161_v30 = vmul.f32 0.2, %v1095_v31  ;;  %vm1145_vm4 = vcmp.ge.f32.partialorder %v1095_v31, 0.0  ;;  %v1179_v55 = vsel %vm1147_vm3, %v1103_v39, %v1163_v47  ;;  %2502 = vmatpush3.bf16.msra.mxu1 %v2640_v27 }
 0x421   :  { %v1097_v44 = vpop.f32.mrf.mxu1  ;;  %2475 = vmatprep.mubr.bf16.mxu0 %v1207_v41  ;;  %2503 = vmatprep.subr.bf16.mxu1 %v2641_v26 }
 0x422   :  { %vm1148_vm6 = vcmp.ge.f32.partialorder %v1106_v33, 0.0  ;;  %v1164_v45 = vmul.f32 0.2, %v1106_v33  ;;  %v1098_v46 = vadd.f32 %v3224_v14, %v1097_v44  ;;  %2476 = vmatmul.mubr.bf16.vlgmr.msra.gmra.mxu0 %v1208_v42  ;;  %v1177_v1 = vsel %vm1145_vm4, %v1095_v31, %v1161_v30  ;;  %v2647_v31 = vld [vmem:[#allocation5 + $0x158] sm:$0xff]  }
 0x423   :  { %v2453_v51 = vpop.f32.mrf.mxu1  ;;  %2524 = vmatpush3.bf16.msra.mxu0 %v2643_v28 }
 0x424   :  { %vm1146_vm7 = vcmp.ge.f32.partialorder %v1098_v46, 0.0  ;;  %v1162_v49 = vmul.f32 0.2, %v1098_v46  ;;  %v1180_v34 = vsel %vm1148_vm6, %v1106_v33, %v1164_v45  ;;  %v1119_v12 = vadd.f32 %v2453_v51, %v3224_v14  ;;  %2504 = vmatpush3.bf16.msra.mxu1 %v2641_v26  ;;  %2525 = vmatprep.subr.bf16.mxu0 %v2644_v25 }
 0x425   :  { %v1110_v56 = vpop.f32.mrf.mxu1  ;;  %v1210_v32 = vpack.c.bf16 %v1180_v34, %v1179_v55 }
 0x426   :  { %v1111_v53 = vadd.f32 %v3224_v14, %v1110_v56  ;;  %v1178_v5 = vsel %vm1146_vm7, %v1098_v46, %v1162_v49  ;;  %v1167_v60 = vmul.f32 0.2, %v1119_v12  ;;  %vm1151_vm10 = vcmp.ge.f32.partialorder %v1119_v12, 0.0 }
 0x427   :  { %v2454_v54 = vpop.f32.mrf.mxu1  ;;  %v1209_v57 = vpack.c.bf16 %v1178_v5, %v1177_v1  ;;  %2526 = vmatpush3.bf16.msra.mxu0 %v2644_v25 }
 0x428   :  { %v1122_v17 = vadd.f32 %v2454_v54, %v3224_v14  ;;  %v1165_v61 = vmul.f32 0.2, %v1111_v53  ;;  %vm1149_vm9 = vcmp.ge.f32.partialorder %v1111_v53, 0.0  ;;  %v1183_v43 = vsel %vm1151_vm10, %v1119_v12, %v1167_v60  ;;  %2527 = vmatprep.subr.bf16.mxu0 %v2645_v6 }
 0x429   :  { %v1113_v20 = vpop.f32.mrf.mxu1  ;;  %2479 = vmatprep.mubr.bf16.mxu0 %v1209_v57 }
 0x42a   :  { %vm1152_vm8 = vcmp.ge.f32.partialorder %v1122_v17, 0.0  ;;  %v1168_v62 = vmul.f32 0.2, %v1122_v17  ;;  %v1114_v63 = vadd.f32 %v3224_v14, %v1113_v20  ;;  %2480 = vmatmul.mubr.bf16.gmra.mxu0 %v1210_v32  ;;  %v1181_v7 = vsel %vm1149_vm9, %v1111_v53, %v1165_v61 }
 0x42b   :  { %v2457_v0 = vpop.f32.mrf.mxu1  ;;  %2528 = vmatpush3.bf16.msra.mxu0 %v2645_v6 }
 0x42c   :  { %vm1150_vm11 = vcmp.ge.f32.partialorder %v1114_v63, 0.0  ;;  %v1166_v2 = vmul.f32 0.2, %v1114_v63  ;;  %v1184_v59 = vsel %vm1152_vm8, %v1122_v17, %v1168_v62  ;;  %v1135_v52 = vadd.f32 %v2457_v0, %v3224_v14  ;;  %2529 = vmatprep.subr.bf16.mxu0 %v2646_v29 }
 0x42d   :  { %v1126_v9 = vpop.f32.mrf.mxu1  ;;  %v1212_v10 = vpack.c.bf16 %v1184_v59, %v1183_v43 }
 0x42e   :  { %v1127_v38 = vadd.f32 %v3224_v14, %v1126_v9  ;;  %v1182_v8 = vsel %vm1150_vm11, %v1114_v63, %v1166_v2  ;;  %v1171_v50 = vmul.f32 0.2, %v1135_v52  ;;  %vm1155_vm14 = vcmp.ge.f32.partialorder %v1135_v52, 0.0 }
 0x42f   :  { %v2458_v4 = vpop.f32.mrf.mxu1  ;;  %v1211_v58 = vpack.c.bf16 %v1182_v8, %v1181_v7  ;;  %2530 = vmatpush3.bf16.msra.mxu0 %v2646_v29 }
 0x430   :  { %v1138_v11 = vadd.f32 %v2458_v4, %v3224_v14  ;;  %v1169_v15 = vmul.f32 0.2, %v1127_v38  ;;  %vm1153_vm13 = vcmp.ge.f32.partialorder %v1127_v38, 0.0  ;;  %v1187_v22 = vsel %vm1155_vm14, %v1135_v52, %v1171_v50  ;;  %2531 = vmatprep.subr.bf16.mxu0 %v2647_v31 }
 0x431   :  { %v1129_v13 = vpop.f32.mrf.mxu1  ;;  %2483 = vmatprep.mubr.bf16.mxu0 %v1211_v58 }
 0x432   :  { %vm1156_vm12 = vcmp.ge.f32.partialorder %v1138_v11, 0.0  ;;  %v1172_v16 = vmul.f32 0.2, %v1138_v11  ;;  %v1130_v3 = vadd.f32 %v3224_v14, %v1129_v13  ;;  %2484 = vmatmul.mubr.bf16.gmra.mxu0 %v1212_v10  ;;  %v1185_v19 = vsel %vm1153_vm13, %v1127_v38, %v1169_v15  ;;  %v2642_v14 = vld [vmem:[#allocation5 + $0x100] sm:$0xff]  }
 0x433   :  { %2505 = vmatprep.subr.bf16.mxu1 %v2642_v14  ;;  %2532 = vmatpush3.bf16.msra.mxu0 %v2647_v31 }
 0x434   :  { %vm1154_vm15 = vcmp.ge.f32.partialorder %v1130_v3, 0.0  ;;  %v1170_v21 = vmul.f32 0.2, %v1130_v3  ;;  %v1188_v24 = vsel %vm1156_vm12, %v1138_v11, %v1172_v16  ;;  %2506 = vmatpush3.bf16.msra.mxu1 %v2642_v14 }
 0x435   :  { %v1214_v48 = vpack.c.bf16 %v1188_v24, %v1187_v22 }
 0x436   :  { %v1186_v18 = vsel %vm1154_vm15, %v1130_v3, %v1170_v21 }
 0x437   :  { %v1213_v23 = vpack.c.bf16 %v1186_v18, %v1185_v19 }
 0x439   :  { %2487 = vmatprep.mubr.bf16.mxu0 %v1213_v23 }
 0x43a   :  { %2488 = vmatmul.mubr.bf16.gmra.mxu0 %v1214_v48 }
 0x4e2   :  { %v2477_v35 = vpop.f32.mrf.mxu0 }
 0x4e3   :  { %v1310_v40 = vadd.f32 %v2477_v35, %v3242_v36 }
 0x4e4   :  { %v1301_v37 = vpop.f32.mrf.mxu0 }
 0x4e5   :  { %v1302_v39 = vadd.f32 %v3242_v36, %v1301_v37  ;;  %v1382_v46 = vmul.f32 0.2, %v1310_v40  ;;  %vm1366_vm2 = vcmp.ge.f32.partialorder %v1310_v40, 0.0 }
 0x4e6   :  { %v2478_v41 = vpop.f32.mrf.mxu0 }
 0x4e7   :  { %v1313_v42 = vadd.f32 %v2478_v41, %v3242_v36  ;;  %v1380_v44 = vmul.f32 0.2, %v1302_v39  ;;  %vm1364_vm1 = vcmp.ge.f32.partialorder %v1302_v39, 0.0  ;;  %v1398_v5 = vsel %vm1366_vm2, %v1310_v40, %v1382_v46  ;;  %v2649_v46 = vld [vmem:[#allocation5 + $0x148] sm:$0xff]  }
 0x4e8   :  { %v1304_v33 = vpop.f32.mrf.mxu0 }
 0x4e9   :  { %vm1367_vm0 = vcmp.ge.f32.partialorder %v1313_v42, 0.0  ;;  %v1383_v30 = vmul.f32 0.2, %v1313_v42  ;;  %v1305_v45 = vadd.f32 %v3242_v36, %v1304_v33  ;;  %v1396_v53 = vsel %vm1364_vm1, %v1302_v39, %v1380_v44 }
 0x4ea   :  { %v2481_v47 = vpop.f32.mrf.mxu0 }
 0x4eb   :  { %vm1365_vm5 = vcmp.ge.f32.partialorder %v1305_v45, 0.0  ;;  %v1381_v51 = vmul.f32 0.2, %v1305_v45  ;;  %v1399_v49 = vsel %vm1367_vm0, %v1313_v42, %v1383_v30  ;;  %v1326_v12 = vadd.f32 %v2481_v47, %v3242_v36  ;;  %v2651_v47 = vld [vmem:[#allocation5 + $0x1b8] sm:$0xff]  }
 0x4ec   :  { %v1317_v56 = vpop.f32.mrf.mxu0  ;;  %v1431_v55 = vpack.c.bf16 %v1399_v49, %v1398_v5  ;;  %2555 = vmatprep.subr.bf16.mxu1 %v2651_v47  ;;  %v2653_v49 = vld [vmem:[#allocation5 + $0x1a8] sm:$0xff]  }
 0x4ed   :  { %v1318_v34 = vadd.f32 %v3242_v36, %v1317_v56  ;;  %v1397_v1 = vsel %vm1365_vm5, %v1305_v45, %v1381_v51  ;;  %v1386_v63 = vmul.f32 0.2, %v1326_v12  ;;  %vm1370_vm3 = vcmp.ge.f32.partialorder %v1326_v12, 0.0  ;;  %v2648_v45 = vld [vmem:[#allocation5 + $0x150] sm:$0xff]   ;;  %v2654_v56 = vld [vmem:[#allocation5 + $0x1a0] sm:$0xff]  }
 0x4ee   :  { %v2482_v54 = vpop.f32.mrf.mxu0  ;;  %v1430_v57 = vpack.c.bf16 %v1397_v1, %v1396_v53  ;;  %2533 = vmatprep.subr.bf16.mxu0 %v2648_v45  ;;  %v2652_v51 = vld [vmem:[#allocation5 + $0x1b0] sm:$0xff]   ;;  %v3260_v1 = vld [vmem:[#allocation7 + $0x5] ss:$0 sm:$0xff] }
 0x4ef   :  { %v1329_v17 = vadd.f32 %v2482_v54, %v3242_v36  ;;  %v1384_v20 = vmul.f32 0.2, %v1318_v34  ;;  %vm1368_vm4 = vcmp.ge.f32.partialorder %v1318_v34, 0.0  ;;  %v1402_v58 = vsel %vm1370_vm3, %v1326_v12, %v1386_v63  ;;  %2534 = vmatpush3.bf16.msra.mxu0 %v2648_v45 }
 0x4f0   :  { %v1320_v32 = vpop.f32.mrf.mxu0  ;;  %2507 = vmatprep.mubr.bf16.mxu1 %v1430_v57  ;;  %2535 = vmatprep.subr.bf16.mxu0 %v2649_v46 }
 0x4f1   :  { %vm1371_vm6 = vcmp.ge.f32.partialorder %v1329_v17, 0.0  ;;  %v1387_v61 = vmul.f32 0.2, %v1329_v17  ;;  %v1321_v62 = vadd.f32 %v3242_v36, %v1320_v32  ;;  %2508 = vmatmul.mubr.bf16.vlgmr.msra.gmra.mxu1 %v1431_v55  ;;  %v1400_v38 = vsel %vm1368_vm4, %v1318_v34, %v1384_v20  ;;  %v2655_v34 = vld [vmem:[#allocation5 + $0x198] sm:$0xff]  }
 0x4f2   :  { %v2485_v60 = vpop.f32.mrf.mxu0  ;;  %2556 = vmatpush3.bf16.msra.mxu1 %v2651_v47 }
 0x4f3   :  { %vm1369_vm7 = vcmp.ge.f32.partialorder %v1321_v62, 0.0  ;;  %v1385_v0 = vmul.f32 0.2, %v1321_v62  ;;  %v1403_v9 = vsel %vm1371_vm6, %v1329_v17, %v1387_v61  ;;  %v1342_v8 = vadd.f32 %v2485_v60, %v3242_v36  ;;  %2536 = vmatpush3.bf16.msra.mxu0 %v2649_v46  ;;  %2557 = vmatprep.subr.bf16.mxu1 %v2652_v51 }
 0x4f4   :  { %v1333_v2 = vpop.f32.mrf.mxu0  ;;  %v1433_v11 = vpack.c.bf16 %v1403_v9, %v1402_v58 }
 0x4f5   :  { %v1334_v59 = vadd.f32 %v3242_v36, %v1333_v2  ;;  %v1401_v7 = vsel %vm1369_vm7, %v1321_v62, %v1385_v0  ;;  %v1390_v3 = vmul.f32 0.2, %v1342_v8  ;;  %vm1374_vm10 = vcmp.ge.f32.partialorder %v1342_v8, 0.0 }
 0x4f6   :  { %v2486_v52 = vpop.f32.mrf.mxu0  ;;  %v1432_v4 = vpack.c.bf16 %v1401_v7, %v1400_v38  ;;  %2558 = vmatpush3.bf16.msra.mxu1 %v2652_v51 }
 0x4f7   :  { %v1345_v43 = vadd.f32 %v2486_v52, %v3242_v36  ;;  %v1388_v13 = vmul.f32 0.2, %v1334_v59  ;;  %vm1372_vm9 = vcmp.ge.f32.partialorder %v1334_v59, 0.0  ;;  %v1406_v14 = vsel %vm1374_vm10, %v1342_v8, %v1390_v3  ;;  %2559 = vmatprep.subr.bf16.mxu1 %v2653_v49 }
 0x4f8   :  { %v1336_v10 = vpop.f32.mrf.mxu0  ;;  %2511 = vmatprep.mubr.bf16.mxu1 %v1432_v4 }
 0x4f9   :  { %vm1375_vm8 = vcmp.ge.f32.partialorder %v1345_v43, 0.0  ;;  %v1391_v15 = vmul.f32 0.2, %v1345_v43  ;;  %v1337_v16 = vadd.f32 %v3242_v36, %v1336_v10  ;;  %2512 = vmatmul.mubr.bf16.gmra.mxu1 %v1433_v11  ;;  %v1404_v23 = vsel %vm1372_vm9, %v1334_v59, %v1388_v13 }
 0x4fa   :  { %v2489_v50 = vpop.f32.mrf.mxu0  ;;  %2560 = vmatpush3.bf16.msra.mxu1 %v2653_v49 }
 0x4fb   :  { %vm1373_vm11 = vcmp.ge.f32.partialorder %v1337_v16, 0.0  ;;  %v1389_v21 = vmul.f32 0.2, %v1337_v16  ;;  %v1407_v19 = vsel %vm1375_vm8, %v1345_v43, %v1391_v15  ;;  %v1358_v48 = vadd.f32 %v2489_v50, %v3242_v36  ;;  %2561 = vmatprep.subr.bf16.mxu1 %v2654_v56 }
 0x4fc   :  { %v1349_v24 = vpop.f32.mrf.mxu0  ;;  %v1435_v25 = vpack.c.bf16 %v1407_v19, %v1406_v14 }
 0x4fd   :  { %v1350_v18 = vadd.f32 %v3242_v36, %v1349_v24  ;;  %v1405_v22 = vsel %vm1373_vm11, %v1337_v16, %v1389_v21  ;;  %v1394_v37 = vmul.f32 0.2, %v1358_v48  ;;  %vm1378_vm14 = vcmp.ge.f32.partialorder %v1358_v48, 0.0 }
 0x4fe   :  { %v2490_v27 = vpop.f32.mrf.mxu0  ;;  %v1434_v26 = vpack.c.bf16 %v1405_v22, %v1404_v23  ;;  %2562 = vmatpush3.bf16.msra.mxu1 %v2654_v56 }
 0x4ff   :  { %v1361_v28 = vadd.f32 %v2490_v27, %v3242_v36  ;;  %v1392_v29 = vmul.f32 0.2, %v1350_v18  ;;  %vm1376_vm13 = vcmp.ge.f32.partialorder %v1350_v18, 0.0  ;;  %v1410_v44 = vsel %vm1378_vm14, %v1358_v48, %v1394_v37  ;;  %2563 = vmatprep.subr.bf16.mxu1 %v2655_v34 }
 0x500   :  { %v1352_v6 = vpop.f32.mrf.mxu0  ;;  %2515 = vmatprep.mubr.bf16.mxu1 %v1434_v26 }
 0x501   :  { %vm1379_vm12 = vcmp.ge.f32.partialorder %v1361_v28, 0.0  ;;  %v1395_v31 = vmul.f32 0.2, %v1361_v28  ;;  %v1353_v35 = vadd.f32 %v3242_v36, %v1352_v6  ;;  %2516 = vmatmul.mubr.bf16.gmra.mxu1 %v1435_v25  ;;  %v1408_v41 = vsel %vm1376_vm13, %v1350_v18, %v1392_v29  ;;  %v2650_v36 = vld [vmem:[#allocation5 + $0x140] sm:$0xff]  }
 0x502   :  { %2537 = vmatprep.subr.bf16.mxu0 %v2650_v36  ;;  %2564 = vmatpush3.bf16.msra.mxu1 %v2655_v34 }
 0x503   :  { %vm1377_vm15 = vcmp.ge.f32.partialorder %v1353_v35, 0.0  ;;  %v1393_v39 = vmul.f32 0.2, %v1353_v35  ;;  %v1411_v40 = vsel %vm1379_vm12, %v1361_v28, %v1395_v31  ;;  %2538 = vmatpush3.bf16.msra.mxu0 %v2650_v36 }
 0x504   :  { %v1437_v30 = vpack.c.bf16 %v1411_v40, %v1410_v44 }
 0x505   :  { %v1409_v42 = vsel %vm1377_vm15, %v1353_v35, %v1393_v39 }
 0x506   :  { %v1436_v33 = vpack.c.bf16 %v1409_v42, %v1408_v41 }
 0x508   :  { %2519 = vmatprep.mubr.bf16.mxu1 %v1436_v33 }
 0x509   :  { %2520 = vmatmul.mubr.bf16.gmra.mxu1 %v1437_v30 }
 0x5b1   :  { %v2509_v53 = vpop.f32.mrf.mxu1 }
 0x5b2   :  { %v1533_v54 = vadd.f32 %v2509_v53, %v3260_v1 }
 0x5b3   :  { %v1524_v5 = vpop.f32.mrf.mxu1 }
 0x5b4   :  { %v1525_v12 = vadd.f32 %v3260_v1, %v1524_v5  ;;  %v1605_v62 = vmul.f32 0.2, %v1533_v54  ;;  %vm1589_vm2 = vcmp.ge.f32.partialorder %v1533_v54, 0.0 }
 0x5b5   :  { %v2510_v57 = vpop.f32.mrf.mxu1 }
 0x5b6   :  { %v1536_v55 = vadd.f32 %v2510_v57, %v3260_v1  ;;  %v1603_v32 = vmul.f32 0.2, %v1525_v12  ;;  %vm1587_vm1 = vcmp.ge.f32.partialorder %v1525_v12, 0.0  ;;  %v1621_v7 = vsel %vm1589_vm2, %v1533_v54, %v1605_v62  ;;  %v2657_v62 = vld [vmem:[#allocation5 + $0x188] sm:$0xff]  }
 0x5b7   :  { %v1527_v17 = vpop.f32.mrf.mxu1 }
 0x5b8   :  { %vm1590_vm0 = vcmp.ge.f32.partialorder %v1536_v55, 0.0  ;;  %v1606_v20 = vmul.f32 0.2, %v1536_v55  ;;  %v1528_v61 = vadd.f32 %v3260_v1, %v1527_v17  ;;  %v1619_v59 = vsel %vm1587_vm1, %v1525_v12, %v1603_v32 }
 0x5b9   :  { %v2513_v63 = vpop.f32.mrf.mxu1 }
 0x5ba   :  { %vm1588_vm5 = vcmp.ge.f32.partialorder %v1528_v61, 0.0  ;;  %v1604_v60 = vmul.f32 0.2, %v1528_v61  ;;  %v1622_v0 = vsel %vm1590_vm0, %v1536_v55, %v1606_v20  ;;  %v1549_v8 = vadd.f32 %v2513_v63, %v3260_v1 }
 0x5bb   :  { %v1540_v2 = vpop.f32.mrf.mxu1  ;;  %v1654_v58 = vpack.c.bf16 %v1622_v0, %v1621_v7 }
 0x5bc   :  { %v1541_v9 = vadd.f32 %v3260_v1, %v1540_v2  ;;  %v1620_v38 = vsel %vm1588_vm5, %v1528_v61, %v1604_v60  ;;  %v1609_v16 = vmul.f32 0.2, %v1549_v8  ;;  %vm1593_vm3 = vcmp.ge.f32.partialorder %v1549_v8, 0.0  ;;  %v2656_v61 = vld [vmem:[#allocation5 + $0x190] sm:$0xff]   ;;  %v3278_v60 = vld [vmem:[#allocation7 + $0x6] ss:$0 sm:$0xff] }
 0x5bd   :  { %v2514_v52 = vpop.f32.mrf.mxu1  ;;  %v1653_v4 = vpack.c.bf16 %v1620_v38, %v1619_v59  ;;  %2565 = vmatprep.subr.bf16.mxu1 %v2656_v61 }
 0x5be   :  { %v1552_v43 = vadd.f32 %v2514_v52, %v3260_v1  ;;  %v1607_v10 = vmul.f32 0.2, %v1541_v9  ;;  %vm1591_vm4 = vcmp.ge.f32.partialorder %v1541_v9, 0.0  ;;  %v1625_v26 = vsel %vm1593_vm3, %v1549_v8, %v1609_v16  ;;  %2566 = vmatpush3.bf16.msra.mxu1 %v2656_v61 }
 0x5bf   :  { %v1543_v11 = vpop.f32.mrf.mxu1  ;;  %2539 = vmatprep.mubr.bf16.mxu0 %v1653_v4  ;;  %2567 = vmatprep.subr.bf16.mxu1 %v2657_v62 }
 0x5c0   :  { %vm1594_vm6 = vcmp.ge.f32.partialorder %v1552_v43, 0.0  ;;  %v1610_v13 = vmul.f32 0.2, %v1552_v43  ;;  %v1544_v15 = vadd.f32 %v3260_v1, %v1543_v11  ;;  %2540 = vmatmul.mubr.bf16.vlgmr.msra.gmra.mxu0 %v1654_v58  ;;  %v1623_v18 = vsel %vm1591_vm4, %v1541_v9, %v1607_v10 }
 0x5c1   :  { %v2517_v3 = vpop.f32.mrf.mxu1 }
 0x5c2   :  { %vm1592_vm7 = vcmp.ge.f32.partialorder %v1544_v15, 0.0  ;;  %v1608_v50 = vmul.f32 0.2, %v1544_v15  ;;  %v1626_v24 = vsel %vm1594_vm6, %v1552_v43, %v1610_v13  ;;  %v1565_v22 = vadd.f32 %v2517_v3, %v3260_v1  ;;  %2568 = vmatpush3.bf16.msra.mxu1 %v2657_v62 }
 0x5c3   :  { %v1556_v21 = vpop.f32.mrf.mxu1  ;;  %v1656_v28 = vpack.c.bf16 %v1626_v24, %v1625_v26 }
 0x5c4   :  { %v1557_v19 = vadd.f32 %v3260_v1, %v1556_v21  ;;  %v1624_v23 = vsel %vm1592_vm7, %v1544_v15, %v1608_v50  ;;  %v1613_v35 = vmul.f32 0.2, %v1565_v22  ;;  %vm1597_vm10 = vcmp.ge.f32.partialorder %v1565_v22, 0.0 }
 0x5c5   :  { %v2518_v48 = vpop.f32.mrf.mxu1  ;;  %v1655_v27 = vpack.c.bf16 %v1624_v23, %v1623_v18 }
 0x5c6   :  { %v1568_v14 = vadd.f32 %v2518_v48, %v3260_v1  ;;  %v1611_v6 = vmul.f32 0.2, %v1557_v19  ;;  %vm1595_vm9 = vcmp.ge.f32.partialorder %v1557_v19, 0.0  ;;  %v1629_v36 = vsel %vm1597_vm10, %v1565_v22, %v1613_v35 }
 0x5c7   :  { %v1559_v25 = vpop.f32.mrf.mxu1  ;;  %2543 = vmatprep.mubr.bf16.mxu0 %v1655_v27 }
 0x5c8   :  { %vm1598_vm8 = vcmp.ge.f32.partialorder %v1568_v14, 0.0  ;;  %v1614_v29 = vmul.f32 0.2, %v1568_v14  ;;  %v1560_v31 = vadd.f32 %v3260_v1, %v1559_v25  ;;  %2544 = vmatmul.mubr.bf16.gmra.mxu0 %v1656_v28  ;;  %v1627_v33 = vsel %vm1595_vm9, %v1557_v19, %v1611_v6 }
 0x5c9   :  { %v2521_v37 = vpop.f32.mrf.mxu1 }
 0x5ca   :  { %vm1596_vm11 = vcmp.ge.f32.partialorder %v1560_v31, 0.0  ;;  %v1612_v39 = vmul.f32 0.2, %v1560_v31  ;;  %v1630_v41 = vsel %vm1598_vm8, %v1568_v14, %v1614_v29  ;;  %v1581_v30 = vadd.f32 %v2521_v37, %v3260_v1 }
 0x5cb   :  { %v1572_v40 = vpop.f32.mrf.mxu1  ;;  %v1658_v51 = vpack.c.bf16 %v1630_v41, %v1629_v36 }
 0x5cc   :  { %v1573_v42 = vadd.f32 %v3260_v1, %v1572_v40  ;;  %v1628_v44 = vsel %vm1596_vm11, %v1560_v31, %v1612_v39  ;;  %v1617_v5 = vmul.f32 0.2, %v1581_v30  ;;  %vm1601_vm14 = vcmp.ge.f32.partialorder %v1581_v30, 0.0 }
 0x5cd   :  { %v2522_v45 = vpop.f32.mrf.mxu1  ;;  %v1657_v46 = vpack.c.bf16 %v1628_v44, %v1627_v33 }
 0x5ce   :  { %v1584_v47 = vadd.f32 %v2522_v45, %v3260_v1  ;;  %v1615_v56 = vmul.f32 0.2, %v1573_v42  ;;  %vm1599_vm13 = vcmp.ge.f32.partialorder %v1573_v42, 0.0  ;;  %v1633_v32 = vsel %vm1601_vm14, %v1581_v30, %v1617_v5 }
 0x5cf   :  { %v1575_v49 = vpop.f32.mrf.mxu1  ;;  %2547 = vmatprep.mubr.bf16.mxu0 %v1657_v46 }
 0x5d0   :  { %vm1602_vm12 = vcmp.ge.f32.partialorder %v1584_v47, 0.0  ;;  %v1618_v34 = vmul.f32 0.2, %v1584_v47  ;;  %v1576_v53 = vadd.f32 %v3260_v1, %v1575_v49  ;;  %2548 = vmatmul.mubr.bf16.gmra.mxu0 %v1658_v51  ;;  %v1631_v57 = vsel %vm1599_vm13, %v1573_v42, %v1615_v56  ;;  %v2658_v1 = vld [vmem:[#allocation5 + $0x180] sm:$0xff]  }
 0x5d1   :  { %2569 = vmatprep.subr.bf16.mxu1 %v2658_v1 }
 0x5d2   :  { %vm1600_vm15 = vcmp.ge.f32.partialorder %v1576_v53, 0.0  ;;  %v1616_v12 = vmul.f32 0.2, %v1576_v53  ;;  %v1634_v54 = vsel %vm1602_vm12, %v1584_v47, %v1618_v34  ;;  %2570 = vmatpush3.bf16.msra.mxu1 %v2658_v1 }
 0x5d3   :  { %v1660_v20 = vpack.c.bf16 %v1634_v54, %v1633_v32 }
 0x5d4   :  { %v1632_v55 = vsel %vm1600_vm15, %v1576_v53, %v1616_v12 }
 0x5d5   :  { %v1659_v17 = vpack.c.bf16 %v1632_v55, %v1631_v57 }
 0x5d7   :  { %2551 = vmatprep.mubr.bf16.mxu0 %v1659_v17 }
 0x5d8   :  { %2552 = vmatmul.mubr.bf16.gmra.mxu0 %v1660_v20 }
 0x680   :  { %v2541_v63 = vpop.f32.mrf.mxu0 }
 0x681   :  { %v1756_v9 = vadd.f32 %v2541_v63, %v3278_v60 }
 0x682   :  { %v1747_v0 = vpop.f32.mrf.mxu0 }
 0x683   :  { %v1748_v2 = vadd.f32 %v3278_v60, %v1747_v0  ;;  %v1828_v58 = vmul.f32 0.2, %v1756_v9  ;;  %vm1812_vm2 = vcmp.ge.f32.partialorder %v1756_v9, 0.0 }
 0x684   :  { %v2542_v59 = vpop.f32.mrf.mxu0 }
 0x685   :  { %v1759_v38 = vadd.f32 %v2542_v59, %v3278_v60  ;;  %v1826_v8 = vmul.f32 0.2, %v1748_v2  ;;  %vm1810_vm1 = vcmp.ge.f32.partialorder %v1748_v2, 0.0  ;;  %v1844_v50 = vsel %vm1812_vm2, %v1756_v9, %v1828_v58 }
 0x686   :  { %v1750_v7 = vpop.f32.mrf.mxu0 }
 0x687   :  { %vm1813_vm0 = vcmp.ge.f32.partialorder %v1759_v38, 0.0  ;;  %v1829_v52 = vmul.f32 0.2, %v1759_v38  ;;  %v1751_v4 = vadd.f32 %v3278_v60, %v1750_v7  ;;  %v1842_v16 = vsel %vm1810_vm1, %v1748_v2, %v1826_v8 }
 0x688   :  { %v2545_v43 = vpop.f32.mrf.mxu0 }
 0x689   :  { %vm1811_vm5 = vcmp.ge.f32.partialorder %v1751_v4, 0.0  ;;  %v1827_v11 = vmul.f32 0.2, %v1751_v4  ;;  %v1845_v10 = vsel %vm1813_vm0, %v1759_v38, %v1829_v52  ;;  %v1772_v21 = vadd.f32 %v2545_v43, %v3278_v60 }
 0x68a   :  { %v1763_v13 = vpop.f32.mrf.mxu0  ;;  %v1877_v18 = vpack.c.bf16 %v1845_v10, %v1844_v50 }
 0x68b   :  { %v1764_v15 = vadd.f32 %v3278_v60, %v1763_v13  ;;  %v1843_v3 = vsel %vm1811_vm5, %v1751_v4, %v1827_v11  ;;  %v1832_v14 = vmul.f32 0.2, %v1772_v21  ;;  %vm1816_vm3 = vcmp.ge.f32.partialorder %v1772_v21, 0.0  ;;  %v3296_v4 = vld [vmem:[#allocation7 + $0x7] ss:$0 sm:$0xff] }
 0x68c   :  { %v2546_v24 = vpop.f32.mrf.mxu0  ;;  %v1876_v19 = vpack.c.bf16 %v1843_v3, %v1842_v16 }
 0x68d   :  { %v1775_v23 = vadd.f32 %v2546_v24, %v3278_v60  ;;  %v1830_v48 = vmul.f32 0.2, %v1764_v15  ;;  %vm1814_vm4 = vcmp.ge.f32.partialorder %v1764_v15, 0.0  ;;  %v1848_v42 = vsel %vm1816_vm3, %v1772_v21, %v1832_v14 }
 0x68e   :  { %v1766_v22 = vpop.f32.mrf.mxu0  ;;  %2571 = vmatprep.mubr.bf16.mxu1 %v1876_v19 }
 0x68f   :  { %vm1817_vm6 = vcmp.ge.f32.partialorder %v1775_v23, 0.0  ;;  %v1833_v27 = vmul.f32 0.2, %v1775_v23  ;;  %v1767_v26 = vadd.f32 %v3278_v60, %v1766_v22  ;;  %2572 = vmatmul.mubr.bf16.vlgmr.msra.gmra.mxu1 %v1877_v18  ;;  %v1846_v35 = vsel %vm1814_vm4, %v1764_v15, %v1830_v48 }
 0x690   :  { %v2549_v28 = vpop.f32.mrf.mxu0 }
 0x691   :  { %vm1815_vm7 = vcmp.ge.f32.partialorder %v1767_v26, 0.0  ;;  %v1831_v25 = vmul.f32 0.2, %v1767_v26  ;;  %v1849_v29 = vsel %vm1817_vm6, %v1775_v23, %v1833_v27  ;;  %v1788_v39 = vadd.f32 %v2549_v28, %v3278_v60 }
 0x692   :  { %v1779_v6 = vpop.f32.mrf.mxu0  ;;  %v1879_v44 = vpack.c.bf16 %v1849_v29, %v1848_v42 }
 0x693   :  { %v1780_v31 = vadd.f32 %v3278_v60, %v1779_v6  ;;  %v1847_v37 = vsel %vm1815_vm7, %v1767_v26, %v1831_v25  ;;  %v1836_v47 = vmul.f32 0.2, %v1788_v39  ;;  %vm1820_vm10 = vcmp.ge.f32.partialorder %v1788_v39, 0.0 }
 0x694   :  { %v2550_v40 = vpop.f32.mrf.mxu0  ;;  %v1878_v41 = vpack.c.bf16 %v1847_v37, %v1846_v35 }
 0x695   :  { %v1791_v33 = vadd.f32 %v2550_v40, %v3278_v60  ;;  %v1834_v45 = vmul.f32 0.2, %v1780_v31  ;;  %vm1818_vm9 = vcmp.ge.f32.partialorder %v1780_v31, 0.0  ;;  %v1852_v17 = vsel %vm1820_vm10, %v1788_v39, %v1836_v47 }
 0x696   :  { %v1782_v30 = vpop.f32.mrf.mxu0  ;;  %2575 = vmatprep.mubr.bf16.mxu1 %v1878_v41 }
 0x697   :  { %vm1821_vm8 = vcmp.ge.f32.partialorder %v1791_v33, 0.0  ;;  %v1837_v46 = vmul.f32 0.2, %v1791_v33  ;;  %v1783_v36 = vadd.f32 %v3278_v60, %v1782_v30  ;;  %2576 = vmatmul.mubr.bf16.gmra.mxu1 %v1879_v44  ;;  %v1850_v5 = vsel %vm1818_vm9, %v1780_v31, %v1834_v45 }
 0x698   :  { %v2553_v51 = vpop.f32.mrf.mxu0 }
 0x699   :  { %vm1819_vm11 = vcmp.ge.f32.partialorder %v1783_v36, 0.0  ;;  %v1835_v49 = vmul.f32 0.2, %v1783_v36  ;;  %v1853_v34 = vsel %vm1821_vm8, %v1791_v33, %v1837_v46  ;;  %v1804_v54 = vadd.f32 %v2553_v51, %v3278_v60 }
 0x69a   :  { %v1795_v56 = vpop.f32.mrf.mxu0  ;;  %v1881_v20 = vpack.c.bf16 %v1853_v34, %v1852_v17 }
 0x69b   :  { %v1796_v53 = vadd.f32 %v3278_v60, %v1795_v56  ;;  %v1851_v12 = vsel %vm1819_vm11, %v1783_v36, %v1835_v49  ;;  %v1840_v0 = vmul.f32 0.2, %v1804_v54  ;;  %vm1824_vm14 = vcmp.ge.f32.partialorder %v1804_v54, 0.0 }
 0x69c   :  { %v2554_v57 = vpop.f32.mrf.mxu0  ;;  %v1880_v55 = vpack.c.bf16 %v1851_v12, %v1850_v5 }
 0x69d   :  { %v1807_v32 = vadd.f32 %v2554_v57, %v3278_v60  ;;  %v1838_v62 = vmul.f32 0.2, %v1796_v53  ;;  %vm1822_vm13 = vcmp.ge.f32.partialorder %v1796_v53, 0.0  ;;  %v1856_v8 = vsel %vm1824_vm14, %v1804_v54, %v1840_v0 }
 0x69e   :  { %v1798_v61 = vpop.f32.mrf.mxu0  ;;  %2579 = vmatprep.mubr.bf16.mxu1 %v1880_v55 }
 0x69f   :  { %vm1825_vm12 = vcmp.ge.f32.partialorder %v1807_v32, 0.0  ;;  %v1841_v1 = vmul.f32 0.2, %v1807_v32  ;;  %v1799_v63 = vadd.f32 %v3278_v60, %v1798_v61  ;;  %2580 = vmatmul.mubr.bf16.gmra.mxu1 %v1881_v20  ;;  %v1854_v59 = vsel %vm1822_vm13, %v1796_v53, %v1838_v62 }
 0x6a1   :  { %vm1823_vm15 = vcmp.ge.f32.partialorder %v1799_v63, 0.0  ;;  %v1839_v2 = vmul.f32 0.2, %v1799_v63  ;;  %v1857_v9 = vsel %vm1825_vm12, %v1807_v32, %v1841_v1 }
 0x6a2   :  { %v1883_v52 = vpack.c.bf16 %v1857_v9, %v1856_v8 }
 0x6a3   :  { %v1855_v38 = vsel %vm1823_vm15, %v1799_v63, %v1839_v2 }
 0x6a4   :  { %v1882_v7 = vpack.c.bf16 %v1855_v38, %v1854_v59 }
 0x6a6   :  { %2583 = vmatprep.mubr.bf16.mxu1 %v1882_v7 }
 0x6a7   :  { %2584 = vmatmul.mubr.bf16.gmra.mxu1 %v1883_v52 }
 0x74f   :  { %v2573_v58 = vpop.f32.mrf.mxu1 }
 0x750   :  { %v1979_v43 = vadd.f32 %v2573_v58, %v3296_v4 }
 0x751   :  { %v1970_v60 = vpop.f32.mrf.mxu1 }
 0x752   :  { %vm2035_vm0 = vcmp.ge.f32.partialorder %v1979_v43, 0.0  ;;  %v2051_v11 = vmul.f32 0.2, %v1979_v43  ;;  %v1971_v10 = vadd.f32 %v3296_v4, %v1970_v60 }
 0x753   :  { %v2574_v13 = vpop.f32.mrf.mxu1 }
 0x754   :  { %v2067_v15 = vsel %vm2035_vm0, %v1979_v43, %v2051_v11  ;;  %vm2033_vm1 = vcmp.ge.f32.partialorder %v1971_v10, 0.0  ;;  %v2049_v16 = vmul.f32 0.2, %v1971_v10  ;;  %v1982_v3 = vadd.f32 %v2574_v13, %v3296_v4 }
 0x755   :  { %v2083_v50 = vmul.f32 1.4142135, %v2067_v15  ;;  %v1973_v21 = vpop.f32.mrf.mxu1 }
 0x756   :  { %v2065_v24 = vsel %vm2033_vm1, %v1971_v10, %v2049_v16  ;;  %vm2036_vm2 = vcmp.ge.f32.partialorder %v1982_v3, 0.0  ;;  %v2052_v19 = vmul.f32 0.2, %v1982_v3  ;;  %v1974_v18 = vadd.f32 %v3296_v4, %v1973_v21 }
 0x757   :  { %2099 = vst [vmem:[#allocation8 + $0x10] sm:$0xff] %v2083_v50  ;;  %v2081_v23 = vmul.f32 1.4142135, %v2065_v24  ;;  %v2577_v22 = vpop.f32.mrf.mxu1 }
 0x758   :  { %v2068_v48 = vsel %vm2036_vm2, %v1982_v3, %v2052_v19  ;;  %vm2034_vm5 = vcmp.ge.f32.partialorder %v1974_v18, 0.0  ;;  %v2050_v27 = vmul.f32 0.2, %v1974_v18  ;;  %v1995_v26 = vadd.f32 %v2577_v22, %v3296_v4 }
 0x759   :  { %2097 = vst [vmem:[#allocation8] sm:$0xff] %v2081_v23  ;;  %v2084_v14 = vmul.f32 1.4142135, %v2068_v48  ;;  %v1986_v28 = vpop.f32.mrf.mxu1 }
 0x75a   :  { %v2066_v25 = vsel %vm2034_vm5, %v1974_v18, %v2050_v27  ;;  %vm2039_vm6 = vcmp.ge.f32.partialorder %v1995_v26, 0.0  ;;  %v2055_v6 = vmul.f32 0.2, %v1995_v26  ;;  %v1987_v29 = vadd.f32 %v3296_v4, %v1986_v28 }
 0x75b   :  { %2100 = vst [vmem:[#allocation8 + $0x18] sm:$0xff] %v2084_v14  ;;  %v2082_v31 = vmul.f32 1.4142135, %v2066_v25  ;;  %v2578_v35 = vpop.f32.mrf.mxu1 }
 0x75c   :  { %v2071_v37 = vsel %vm2039_vm6, %v1995_v26, %v2055_v6  ;;  %vm2037_vm4 = vcmp.ge.f32.partialorder %v1987_v29, 0.0  ;;  %v2053_v39 = vmul.f32 0.2, %v1987_v29  ;;  %v1998_v40 = vadd.f32 %v2578_v35, %v3296_v4 }
 0x75d   :  { %2098 = vst [vmem:[#allocation8 + $0x8] sm:$0xff] %v2082_v31  ;;  %v2087_v41 = vmul.f32 1.4142135, %v2071_v37  ;;  %v1989_v42 = vpop.f32.mrf.mxu1 }
 0x75e   :  { %v2069_v33 = vsel %vm2037_vm4, %v1987_v29, %v2053_v39  ;;  %vm2040_vm3 = vcmp.ge.f32.partialorder %v1998_v40, 0.0  ;;  %v2056_v44 = vmul.f32 0.2, %v1998_v40  ;;  %v1990_v30 = vadd.f32 %v3296_v4, %v1989_v42 }
 0x75f   :  { %2103 = vst [vmem:[#allocation8 + $0x30] sm:$0xff] %v2087_v41  ;;  %v2085_v45 = vmul.f32 1.4142135, %v2069_v33  ;;  %v2581_v46 = vpop.f32.mrf.mxu1 }
 0x760   :  { %v2072_v36 = vsel %vm2040_vm3, %v1998_v40, %v2056_v44  ;;  %vm2038_vm7 = vcmp.ge.f32.partialorder %v1990_v30, 0.0  ;;  %v2054_v47 = vmul.f32 0.2, %v1990_v30  ;;  %v2011_v51 = vadd.f32 %v2581_v46, %v3296_v4 }
 0x761   :  { %2101 = vst [vmem:[#allocation8 + $0x20] sm:$0xff] %v2085_v45  ;;  %v2088_v49 = vmul.f32 1.4142135, %v2072_v36  ;;  %v2002_v56 = vpop.f32.mrf.mxu1 }
 0x762   :  { %v2070_v34 = vsel %vm2038_vm7, %v1990_v30, %v2054_v47  ;;  %vm2043_vm8 = vcmp.ge.f32.partialorder %v2011_v51, 0.0  ;;  %v2059_v53 = vmul.f32 0.2, %v2011_v51  ;;  %v2003_v5 = vadd.f32 %v3296_v4, %v2002_v56 }
 0x763   :  { %2104 = vst [vmem:[#allocation8 + $0x38] sm:$0xff] %v2088_v49  ;;  %v2086_v12 = vmul.f32 1.4142135, %v2070_v34  ;;  %v2582_v54 = vpop.f32.mrf.mxu1 }
 0x764   :  { %v2075_v57 = vsel %vm2043_vm8, %v2011_v51, %v2059_v53  ;;  %vm2041_vm9 = vcmp.ge.f32.partialorder %v2003_v5, 0.0  ;;  %v2057_v55 = vmul.f32 0.2, %v2003_v5  ;;  %v2014_v17 = vadd.f32 %v2582_v54, %v3296_v4 }
 0x765   :  { %2102 = vst [vmem:[#allocation8 + $0x28] sm:$0xff] %v2086_v12  ;;  %v2091_v32 = vmul.f32 1.4142135, %v2075_v57  ;;  %v2005_v20 = vpop.f32.mrf.mxu1 }
 0x766   :  { %v2073_v61 = vsel %vm2041_vm9, %v2003_v5, %v2057_v55  ;;  %vm2044_vm10 = vcmp.ge.f32.partialorder %v2014_v17, 0.0  ;;  %v2060_v62 = vmul.f32 0.2, %v2014_v17  ;;  %v2006_v1 = vadd.f32 %v3296_v4, %v2005_v20 }
 0x767   :  { %2107 = vst [vmem:[#allocation8 + $0x50] sm:$0xff] %v2091_v32  ;;  %v2089_v63 = vmul.f32 1.4142135, %v2073_v61  ;;  %v2585_v0 = vpop.f32.mrf.mxu1 }
 0x768   :  { %v2076_v2 = vsel %vm2044_vm10, %v2014_v17, %v2060_v62  ;;  %vm2042_vm11 = vcmp.ge.f32.partialorder %v2006_v1, 0.0  ;;  %v2058_v9 = vmul.f32 0.2, %v2006_v1  ;;  %v2027_v59 = vadd.f32 %v2585_v0, %v3296_v4 }
 0x769   :  { %2105 = vst [vmem:[#allocation8 + $0x40] sm:$0xff] %v2089_v63  ;;  %v2092_v38 = vmul.f32 1.4142135, %v2076_v2  ;;  %v2018_v7 = vpop.f32.mrf.mxu1 }
 0x76a   :  { %v2074_v8 = vsel %vm2042_vm11, %v2006_v1, %v2058_v9  ;;  %vm2047_vm12 = vcmp.ge.f32.partialorder %v2027_v59, 0.0  ;;  %v2063_v52 = vmul.f32 0.2, %v2027_v59  ;;  %v2019_v58 = vadd.f32 %v3296_v4, %v2018_v7 }
 0x76b   :  { %2108 = vst [vmem:[#allocation8 + $0x58] sm:$0xff] %v2092_v38  ;;  %v2090_v43 = vmul.f32 1.4142135, %v2074_v8  ;;  %v2586_v60 = vpop.f32.mrf.mxu1 }
 0x76c   :  { %v2079_v11 = vsel %vm2047_vm12, %v2027_v59, %v2063_v52  ;;  %vm2045_vm13 = vcmp.ge.f32.partialorder %v2019_v58, 0.0  ;;  %v2061_v10 = vmul.f32 0.2, %v2019_v58  ;;  %v2030_v13 = vadd.f32 %v2586_v60, %v3296_v4 }
 0x76d   :  { %2106 = vst [vmem:[#allocation8 + $0x48] sm:$0xff] %v2090_v43  ;;  %v2095_v15 = vmul.f32 1.4142135, %v2079_v11  ;;  %v2021_v16 = vpop.f32.mrf.mxu1 }
 0x76e   :  { %v2077_v3 = vsel %vm2045_vm13, %v2019_v58, %v2061_v10  ;;  %vm2048_vm14 = vcmp.ge.f32.partialorder %v2030_v13, 0.0  ;;  %v2064_v50 = vmul.f32 0.2, %v2030_v13  ;;  %v2022_v21 = vadd.f32 %v3296_v4, %v2021_v16 }
 0x76f   :  { %2111 = vst [vmem:[#allocation8 + $0x70] sm:$0xff] %v2095_v15  ;;  %v2093_v24 = vmul.f32 1.4142135, %v2077_v3 }
 0x770   :  { %v2080_v19 = vsel %vm2048_vm14, %v2030_v13, %v2064_v50  ;;  %vm2046_vm15 = vcmp.ge.f32.partialorder %v2022_v21, 0.0  ;;  %v2062_v18 = vmul.f32 0.2, %v2022_v21 }
 0x771   :  { %2109 = vst [vmem:[#allocation8 + $0x60] sm:$0xff] %v2093_v24  ;;  %v2096_v23 = vmul.f32 1.4142135, %v2080_v19 }
 0x772   :  { %v2078_v22 = vsel %vm2046_vm15, %v2022_v21, %v2062_v18 }
 0x773   :  { %2112 = vst [vmem:[#allocation8 + $0x78] sm:$0xff] %v2096_v23  ;;  %v2094_v48 = vmul.f32 1.4142135, %v2078_v22 }
 0x775   :  { %2110 = vst [vmem:[#allocation8 + $0x68] sm:$0xff] %v2094_v48 }
 0x776   :  { %2117 = vsyncadd [#allocation4], 2016  ;;  %s2814_s0 = smov [#allocation8]  }
 0x777   :  { %s2118_s7 = sshll.u32 %s2814_s0, 4  ;;  %s2119_s7 = int_to_ptr.vmem [resolvable:$true] %s2118_s7 }
 0x778   :  { %s2783_s8 = scalar_lea.vmem %s2119_s7, 32  ;;  %s2787_s9 = scalar_lea.vmem %s2119_s7, 2048 }
 0x779   :  { %p2784_p1 = scmp.ne.s32.totalorder %s2119_s7, %s2783_s8  ;;  %p2788_p2 = scmp.lt.s32.totalorder %s2119_s7, %s2119_s7 }
 0x77a   :  { %p2789_p3 = scmp.lt.s32.totalorder %s2787_s9, %s2783_s8 }
 0x77c   :  { %p2790_p4 = por %p2789_p3, %p2788_p2 }
 0x77e   :  { %p2791_p5 = pnand %p2790_p4, %p2784_p1 }
 0x780   :  { %2794 = shalt.err (!%p2791_p5)
}
 0x781   :  { %s2815_s3 = smov 32   ;;  %s2816_s10 = smov 2  }
 0x782   :  { %2124 = dma.vmem_to_hbm [thread:$0]  %s2119_s7, 32, %s3321_s4, [#allocation4], %s2815_s3, %s2815_s3, %s2816_s10  }
 0x783   :  { %2807 = dma.done.wait [#allocation4], 2048  }
 0x784   :  { %2808 = vsyncadd [#allocation4], 4294965248 }
 0x785   :  { %2128 = vsyncpa [#allocation3], 1 }
 0x786   :  { %2129 = vsyncpa [#allocation6], 1 }
 0x787   :  { %2130 = vsyncpa [#allocation4], 1 }

</bundles_post_ra>
